<compile_context>
chip_gen: v5e
topology: v5e:2x2
jax: 0.10.0
libtpu: 0.0.40
codegen_flags: <defaults>
</compile_context>

<pallas_src>
import functools
import math

import jax
import jax.numpy as jnp
from jax.experimental import pallas as pl
from jax.experimental.pallas import tpu as pltpu

MLPMAT_INNER_SIZE = 64
MATRIX_NUM_PARAMS = MLPMAT_INNER_SIZE * MLPMAT_INNER_SIZE  # 4096
MLP_SCALE = 4

_GELU_C = math.sqrt(2.0 / math.pi)


def _gelu_tanh(h):
    # PyTorch nn.GELU(approximate='tanh'), computed in f32 (EUP tanh).
    return 0.5 * h * (1.0 + jnp.tanh(_GELU_C * (h + 0.044715 * h * h * h)))


def _round_up(n, m):
    return ((n + m - 1) // m) * m


def _vmem_capacity_bytes():
    try:
        return int(pltpu.get_tpu_info().vmem_capacity_bytes)
    except Exception:
        return 64 * 1024 * 1024  # v7x per-TensorCore capacity; safe lower bound


def fat_mlp_kernel(x_ref, w_fc_ref, b_fc_ref, w_pb_ref, b_pb_ref,
                   w_pm_ref, b_pm_ref, m_ref, b_ref, hb_ref, *, streamed):
    """One (row-tile, m-column-tile) grid step. bf16 MXU inputs, f32 accumulate."""

    def hidden_and_b():
        xb = x_ref[...].astype(jnp.bfloat16)                  # in-kernel cast: free VPU filler
        h = jnp.dot(xb, w_fc_ref[...], preferred_element_type=jnp.float32)
        h = _gelu_tanh(h + b_fc_ref[...])                     # (TM, F) f32
        hb = h.astype(jnp.bfloat16)
        b_out = jnp.dot(hb, w_pb_ref[...], preferred_element_type=jnp.float32) + b_pb_ref[...]
        b_ref[...] = b_out.astype(b_ref.dtype)                # resident across the column axis
        return hb

    if streamed:
        # Column axis is the inner ("arbitrary") grid dim: compute the gelu hidden state
        # and the "b" projection once per row tile, cache hb in VMEM scratch.
        @pl.when(pl.program_id(1) == 0)
        def _():
            hb_ref[...] = hidden_and_b()
        hb = hb_ref[...]
    else:
        hb = hidden_and_b()

    m_out = jnp.dot(hb, w_pm_ref[...], preferred_element_type=jnp.float32) + b_pm_ref[...]
    m_ref[...] = m_out.astype(m_ref.dtype)                    # lane-dense (TM, TN)


def fat_mlp(x, params, *, block_rows=256, col_block=1024, out_dtype=None,
            stream_columns=None):
    """x: (..., n_embd) -> (m: (..., 4096), b: (..., n_embd))."""
    *lead, C = x.shape
    N = int(math.prod(lead)) if lead else 1
    F = params["w_fc_t"].shape[1]
    M = params["w_pm_t"].shape[1]
    out_dtype = jnp.dtype(out_dtype) if out_dtype is not None else x.dtype
    x_isz = jnp.dtype(x.dtype).itemsize
    o_isz = jnp.dtype(out_dtype).itemsize

    x2 = x.reshape(N, C)   # no dtype cast, no padding: ragged last tile is masked by Pallas

    # --- Row tile: multiple of 8; keep >= 2 row tiles so the "parallel" axis can shard
    # across v7x's two TensorCores (no effect on 1-TC v5e/v6e).
    TM = min(block_rows, _round_up(N, 8))
    if pl.cdiv(N, TM) < 2 and N > 8:
        TM = _round_up(pl.cdiv(N, 2), 8)

    # --- Per-core VMEM budget, generation-aware.
    cap = _vmem_capacity_bytes()
    budget = int(0.85 * cap)

    def est_vmem(tm, tn, streamed):
        w_resident = (C * F + F * C) * 2 + (F + C) * 4              # Buffered(1) bf16 W + f32 b
        w_pm = (F * tn * 2 + tn * 4) * (2 if streamed else 1)       # streamed -> double-buffered
        io = 2 * tm * C * x_isz + 2 * tm * (tn + C) * o_isz         # double-buffered x & outputs
        scratch = tm * F * 2 if streamed else 8 * 128 * 2
        # in-kernel intermediates: h f32, hb bf16, pre-cast f32 m/b, bf16 x cast
        interm = tm * F * 4 + tm * F * 2 + tm * tn * 4 + tm * C * 4 + tm * C * 2
        return w_resident + w_pm + io + scratch + interm

    # --- m-projection column tiling: keep W_pm fully resident when it fits, otherwise
    # stream it over an inner "arbitrary" grid axis (needed on v7x at real GPT sizes).
    if stream_columns is None:
        stream_columns = est_vmem(TM, M, streamed=False) > budget
    if stream_columns:
        TN = min(col_block, M)
        while M % TN != 0:
            TN //= 2
        while est_vmem(TM, TN, True) > budget and TN > 128 and M % (TN // 2) == 0:
            TN //= 2
    else:
        TN = M
    n_col = M // TN
    streamed = n_col > 1

    # Last resort: shrink the row tile if the budget is still exceeded.
    while est_vmem(TM, TN, streamed) > budget and TM > 8:
        TM = max(8, _round_up(TM // 2, 8))
    n_row = pl.cdiv(N, TM)

    grid = (n_row, n_col)
    row_map = lambda i, j: (i, 0)
    const_map = lambda i, j: (0, 0)
    col_map = (lambda i, j: (0, j)) if streamed else const_map
    pm_kwargs = {} if streamed else {"pipeline_mode": pl.Buffered(1)}

    flops = 2 * N * F * (2 * C + M)
    bytes_accessed = (
        N * C * x_isz
        + (C * F + F * C) * 2 + (F + C + M) * 4
        + F * M * 2 * (n_row if streamed else 1)
        + N * (M + C) * o_isz
    )
    cost = pl.CostEstimate(flops=flops, transcendentals=N * F,
                           bytes_accessed=bytes_accessed)

    vmem_limit = int(0.9 * cap)

    kernel = functools.partial(fat_mlp_kernel, streamed=streamed)
    hb_scratch = pltpu.VMEM((TM, F) if streamed else (8, 128), jnp.bfloat16)

    m2, b2 = pl.pallas_call(
        kernel,
        out_shape=(
            jax.ShapeDtypeStruct((N, M), out_dtype),   # m
            jax.ShapeDtypeStruct((N, C), out_dtype),   # b
        ),
        grid=grid,
        in_specs=[
            pl.BlockSpec((TM, C), row_map),                                    # x rows
            pl.BlockSpec((C, F), const_map, pipeline_mode=pl.Buffered(1)),     # W_fc^T (bf16)
            pl.BlockSpec((1, F), const_map, pipeline_mode=pl.Buffered(1)),     # b_fc   (f32)
            pl.BlockSpec((F, C), const_map, pipeline_mode=pl.Buffered(1)),     # W_proj^T[:, :C]
            pl.BlockSpec((1, C), const_map, pipeline_mode=pl.Buffered(1)),     # b_proj[:C]
            pl.BlockSpec((F, TN), col_map, **pm_kwargs),                       # W_proj^T[:, C:]
            pl.BlockSpec((1, TN), col_map, **pm_kwargs),                       # b_proj[C:]
        ],
        out_specs=(
            pl.BlockSpec((TM, TN), lambda i, j: (i, j)),                       # m (lane-dense)
            pl.BlockSpec((TM, C), row_map),                                    # b
        ),
        scratch_shapes=[hb_scratch],
        compiler_params=pltpu.CompilerParams(
            dimension_semantics=("parallel", "arbitrary"),
            vmem_limit_bytes=vmem_limit,
        ),
        cost_estimate=cost,
    )(x2,
      params["w_fc_t"], params["b_fc"],
      params["w_pb_t"], params["b_pb"],
      params["w_pm_t"], params["b_pm"])

    m = m2.reshape(*lead, M)
    b = b2.reshape(*lead, C)
    return m, b


def reference_fat_mlp(x, params):
    """Pure-JAX mirror of the forward with the same bf16-matmul precision."""
    xb = x.astype(jnp.bfloat16)
    h = jnp.dot(xb, params["w_fc_t"], preferred_element_type=jnp.float32) + params["b_fc"][0]
    h = _gelu_tanh(h)
    hb = h.astype(jnp.bfloat16)
    b = jnp.dot(hb, params["w_pb_t"], preferred_element_type=jnp.float32) + params["b_pb"][0]
    m = jnp.dot(hb, params["w_pm_t"], preferred_element_type=jnp.float32) + params["b_pm"][0]
    return m, b


def make_params(key, n_embd, mlp_scale=MLP_SCALE):
    """Build parameters in PyTorch layout, then pre-transpose / pre-split for the kernel."""
    C, F, M = n_embd, mlp_scale * n_embd, MATRIX_NUM_PARAMS
    ks = jax.random.split(key, 4)
    std = 0.02
    w_fc = jax.random.normal(ks[0], (F, C), jnp.float32) * std        # nn.Linear (out, in)
    b_fc = jax.random.normal(ks[1], (F,), jnp.float32) * std
    w_proj = jax.random.normal(ks[2], (C + M, F), jnp.float32) * std  # (out, in)
    b_proj = jax.random.normal(ks[3], (C + M,), jnp.float32) * std
    return {
        "w_fc_t": w_fc.T.astype(jnp.bfloat16),             # (C, F)
        "b_fc": b_fc.reshape(1, F),
        "w_pb_t": w_proj[:C].T.astype(jnp.bfloat16),        # (F, C)   -> "b" columns
        "b_pb": b_proj[:C].reshape(1, C),
        "w_pm_t": w_proj[C:].T.astype(jnp.bfloat16),        # (F, M)   -> "m" columns
        "b_pm": b_proj[C:].reshape(1, M),
    }


if __name__ == "__main__":
    # Small config consistent with the module: n_embd=32 -> hidden=128,
    # c_proj output = 32 + 64*64 = 4128, split into b:(...,32), m:(...,4096).
    B, T, C = 2, 8, 32
    key = jax.random.PRNGKey(0)
    kx, kp = jax.random.split(key)
    x = jax.random.normal(kx, (B, T, C), dtype=jnp.float32)
    params = make_params(kp, C)

    m_ref, b_ref = reference_fat_mlp(x, params)

    # 1) Auto path (weights fully resident, single column tile at these shapes).
    m, b = fat_mlp(x, params)
    m, b = jax.block_until_ready((m, b))
    assert m.shape == (B, T, MATRIX_NUM_PARAMS), m.shape
    assert b.shape == (B, T, C), b.shape
    assert jnp.allclose(m, m_ref, atol=1e-3, rtol=1e-2), "m mismatch vs reference (resident path)"
    assert jnp.allclose(b, b_ref, atol=1e-3, rtol=1e-2), "b mismatch vs reference (resident path)"

    # 2) Forced column-streaming path (the v7x large-weight regime), same numerics.
    m_s, b_s = fat_mlp(x, params, stream_columns=True, col_block=1024)
    m_s, b_s = jax.block_until_ready((m_s, b_s))
    assert jnp.allclose(m_s, m_ref, atol=1e-3, rtol=1e-2), "m mismatch vs reference (streamed path)"
    assert jnp.allclose(b_s, b_ref, atol=1e-3, rtol=1e-2), "b mismatch vs reference (streamed path)"

    print("KERNEL_OK")
</pallas_src>

<mosaic_0001>
module attributes {stable_mosaic.version = 11 : i64} {
  func.func @fat_mlp_kernel(%arg0: i32, %arg1: i32, %arg2: memref<8x32xf32, #tpu.memory_space<vmem>>, %arg3: memref<32x128xbf16, #tpu.memory_space<vmem>>, %arg4: memref<1x128xf32, #tpu.memory_space<vmem>>, %arg5: memref<128x32xbf16, #tpu.memory_space<vmem>>, %arg6: memref<1x32xf32, #tpu.memory_space<vmem>>, %arg7: memref<128x4096xbf16, #tpu.memory_space<vmem>>, %arg8: memref<1x4096xf32, #tpu.memory_space<vmem>>, %arg9: memref<8x4096xf32, #tpu.memory_space<vmem>>, %arg10: memref<8x32xf32, #tpu.memory_space<vmem>>, %arg11: memref<8x128xbf16, #tpu.memory_space<vmem>>) attributes {dimension_semantics = [#tpu.dimension_semantics<parallel>, #tpu.dimension_semantics<arbitrary>], iteration_bounds = array<i64: 2, 1>, scalar_prefetch = 0 : i64, scratch_operands = 1 : i64, tpu.core_type = #tpu.core_type<tc>, window_params = [{transform_indices = @transform_0, window_bounds = array<i64: 8, 32>}, {pipeline_mode = #tpu.pipeline_mode<synchronous>, transform_indices = @transform_1, window_bounds = array<i64: 32, 128>}, {pipeline_mode = #tpu.pipeline_mode<synchronous>, transform_indices = @transform_2, window_bounds = array<i64: 1, 128>}, {pipeline_mode = #tpu.pipeline_mode<synchronous>, transform_indices = @transform_3, window_bounds = array<i64: 128, 32>}, {pipeline_mode = #tpu.pipeline_mode<synchronous>, transform_indices = @transform_4, window_bounds = array<i64: 1, 32>}, {pipeline_mode = #tpu.pipeline_mode<synchronous>, transform_indices = @transform_5, window_bounds = array<i64: 128, 4096>}, {pipeline_mode = #tpu.pipeline_mode<synchronous>, transform_indices = @transform_6, window_bounds = array<i64: 1, 4096>}, {transform_indices = @transform_7, window_bounds = array<i64: 8, 4096>}, {transform_indices = @transform_8, window_bounds = array<i64: 8, 32>}]} {
    %c0 = arith.constant 0 : index
    %c0_0 = arith.constant 0 : index
    %0 = vector.load %arg2[%c0, %c0_0] : memref<8x32xf32, #tpu.memory_space<vmem>>, vector<8x32xf32>
    %1 = arith.truncf %0 : vector<8x32xf32> to vector<8x32xbf16>
    %c0_1 = arith.constant 0 : index
    %c0_2 = arith.constant 0 : index
    %2 = vector.load %arg3[%c0_1, %c0_2] : memref<32x128xbf16, #tpu.memory_space<vmem>>, vector<32x128xbf16>
    %cst = arith.constant dense<0.000000e+00> : vector<8x128xf32>
    %3 = tpu.matmul %1, %2, %cst {dimension_numbers = #tpu.dot_dimension_numbers<[1], [0], [0], [1], [0, 0, 1, 1], [], []>} : vector<8x32xbf16>, vector<32x128xbf16>, vector<8x128xf32> -> vector<8x128xf32>
    %c0_3 = arith.constant 0 : index
    %c0_4 = arith.constant 0 : index
    %4 = vector.load %arg4[%c0_3, %c0_4] : memref<1x128xf32, #tpu.memory_space<vmem>>, vector<1x128xf32>
    %5 = vector.broadcast %4 : vector<1x128xf32> to vector<8x128xf32>
    %6 = arith.addf %3, %5 : vector<8x128xf32>
    %cst_5 = arith.constant 5.000000e-01 : f32
    %7 = vector.broadcast %cst_5 : f32 to vector<8x128xf32>
    %8 = arith.mulf %7, %6 : vector<8x128xf32>
    %cst_6 = arith.constant 4.471500e-02 : f32
    %9 = vector.broadcast %cst_6 : f32 to vector<8x128xf32>
    %10 = arith.mulf %9, %6 : vector<8x128xf32>
    %11 = arith.mulf %10, %6 : vector<8x128xf32>
    %12 = arith.mulf %11, %6 : vector<8x128xf32>
    %13 = arith.addf %6, %12 : vector<8x128xf32>
    %cst_7 = arith.constant 0.797884583 : f32
    %14 = vector.broadcast %cst_7 : f32 to vector<8x128xf32>
    %15 = arith.mulf %14, %13 : vector<8x128xf32>
    %16 = math.tanh %15 : vector<8x128xf32>
    %cst_8 = arith.constant 1.000000e+00 : f32
    %17 = vector.broadcast %cst_8 : f32 to vector<8x128xf32>
    %18 = arith.addf %17, %16 : vector<8x128xf32>
    %19 = arith.mulf %8, %18 : vector<8x128xf32>
    %20 = arith.truncf %19 : vector<8x128xf32> to vector<8x128xbf16>
    %c0_9 = arith.constant 0 : index
    %c0_10 = arith.constant 0 : index
    %21 = vector.load %arg5[%c0_9, %c0_10] : memref<128x32xbf16, #tpu.memory_space<vmem>>, vector<128x32xbf16>
    %cst_11 = arith.constant dense<0.000000e+00> : vector<8x32xf32>
    %22 = tpu.matmul %20, %21, %cst_11 {dimension_numbers = #tpu.dot_dimension_numbers<[1], [0], [0], [1], [0, 0, 1, 1], [], []>} : vector<8x128xbf16>, vector<128x32xbf16>, vector<8x32xf32> -> vector<8x32xf32>
    %c0_12 = arith.constant 0 : index
    %c0_13 = arith.constant 0 : index
    %23 = vector.load %arg6[%c0_12, %c0_13] : memref<1x32xf32, #tpu.memory_space<vmem>>, vector<1x32xf32>
    %24 = vector.broadcast %23 : vector<1x32xf32> to vector<8x32xf32>
    %25 = arith.addf %22, %24 : vector<8x32xf32>
    %c0_14 = arith.constant 0 : index
    %c0_15 = arith.constant 0 : index
    %26 = vector.load %arg10[%c0_14, %c0_15] : memref<8x32xf32, #tpu.memory_space<vmem>>, vector<8x32xf32>
    tpu.vector_store %arg10[%c0_14, %c0_15], %25 {strides = array<i32>} : memref<8x32xf32, #tpu.memory_space<vmem>>, vector<8x32xf32>,
    %c0_16 = arith.constant 0 : index
    %c0_17 = arith.constant 0 : index
    %27 = vector.load %arg7[%c0_16, %c0_17] : memref<128x4096xbf16, #tpu.memory_space<vmem>>, vector<128x4096xbf16>
    %cst_18 = arith.constant dense<0.000000e+00> : vector<8x4096xf32>
    %28 = tpu.matmul %20, %27, %cst_18 {dimension_numbers = #tpu.dot_dimension_numbers<[1], [0], [0], [1], [0, 0, 1, 1], [], []>} : vector<8x128xbf16>, vector<128x4096xbf16>, vector<8x4096xf32> -> vector<8x4096xf32>
    %c0_19 = arith.constant 0 : index
    %c0_20 = arith.constant 0 : index
    %29 = vector.load %arg8[%c0_19, %c0_20] : memref<1x4096xf32, #tpu.memory_space<vmem>>, vector<1x4096xf32>
    %30 = vector.broadcast %29 : vector<1x4096xf32> to vector<8x4096xf32>
    %31 = arith.addf %28, %30 : vector<8x4096xf32>
    %c0_21 = arith.constant 0 : index
    %c0_22 = arith.constant 0 : index
    %32 = vector.load %arg9[%c0_21, %c0_22] : memref<8x4096xf32, #tpu.memory_space<vmem>>, vector<8x4096xf32>
    tpu.vector_store %arg9[%c0_21, %c0_22], %31 {strides = array<i32>} : memref<8x4096xf32, #tpu.memory_space<vmem>>, vector<8x4096xf32>,
    return
  }
  func.func @transform_0(%arg0: i32, %arg1: i32) -> (i32, i32) {
    %c0_i32 = arith.constant 0 : i32
    %c0_i32_0 = arith.constant 0 : i32
    return %arg0, %c0_i32 : i32, i32
  }
  func.func @transform_1(%arg0: i32, %arg1: i32) -> (i32, i32) {
    %c0_i32 = arith.constant 0 : i32
    %c0_i32_0 = arith.constant 0 : i32
    %c0_i32_1 = arith.constant 0 : i32
    return %c0_i32, %c0_i32_0 : i32, i32
  }
  func.func @transform_2(%arg0: i32, %arg1: i32) -> (i32, i32) {
    %c0_i32 = arith.constant 0 : i32
    %c0_i32_0 = arith.constant 0 : i32
    %c0_i32_1 = arith.constant 0 : i32
    return %c0_i32, %c0_i32_0 : i32, i32
  }
  func.func @transform_3(%arg0: i32, %arg1: i32) -> (i32, i32) {
    %c0_i32 = arith.constant 0 : i32
    %c0_i32_0 = arith.constant 0 : i32
    %c0_i32_1 = arith.constant 0 : i32
    return %c0_i32, %c0_i32_0 : i32, i32
  }
  func.func @transform_4(%arg0: i32, %arg1: i32) -> (i32, i32) {
    %c0_i32 = arith.constant 0 : i32
    %c0_i32_0 = arith.constant 0 : i32
    %c0_i32_1 = arith.constant 0 : i32
    return %c0_i32, %c0_i32_0 : i32, i32
  }
  func.func @transform_5(%arg0: i32, %arg1: i32) -> (i32, i32) {
    %c0_i32 = arith.constant 0 : i32
    %c0_i32_0 = arith.constant 0 : i32
    %c0_i32_1 = arith.constant 0 : i32
    return %c0_i32, %c0_i32_0 : i32, i32
  }
  func.func @transform_6(%arg0: i32, %arg1: i32) -> (i32, i32) {
    %c0_i32 = arith.constant 0 : i32
    %c0_i32_0 = arith.constant 0 : i32
    %c0_i32_1 = arith.constant 0 : i32
    return %c0_i32, %c0_i32_0 : i32, i32
  }
  func.func @transform_7(%arg0: i32, %arg1: i32) -> (i32, i32) {
    %c0_i32 = arith.constant 0 : i32
    return %arg0, %arg1 : i32, i32
  }
  func.func @transform_8(%arg0: i32, %arg1: i32) -> (i32, i32) {
    %c0_i32 = arith.constant 0 : i32
    %c0_i32_0 = arith.constant 0 : i32
    return %arg0, %c0_i32 : i32, i32
  }
}

</mosaic_0001>

<bundles_post_ra>
// kernel: tpu_custom_call.1
= control target key start
LH: loop header
LB: loop body
LE: loop exit
PB: predicated region body
PF: predicated region fallthrough
CT: control target
= control target key end

     0   :  { %s4583_s0 = inlined_call_operand.vmem [shape: f32[16,32], index: 0, kind: input, shape index: {}]   ;;  %s4584_s1 = inlined_call_operand.vmem [shape: bf16[32,128], index: 1, kind: input, shape index: {}]   ;;  %s4585_s2 = inlined_call_operand.vmem [shape: f32[1,128], index: 2, kind: input, shape index: {}]   ;;  %s4586_s3 = inlined_call_operand.vmem [shape: bf16[128,32], index: 3, kind: input, shape index: {}]   ;;  %s4587_s4 = inlined_call_operand.vmem [shape: f32[1,32], index: 4, kind: input, shape index: {}]   ;;  %s4588_s5 = inlined_call_operand.hbm [shape: bf16[128,4096], index: 5, kind: input, shape index: {}]   ;;  %s4589_s6 = inlined_call_operand.vmem [shape: f32[1,4096], index: 6, kind: input, shape index: {}]   ;;  %s4590_s7 = inlined_call_operand.hbm [shape: f32[16,4096], index: 7, kind: output, shape index: {0}]   ;;  %s4591_s8 = inlined_call_operand.hbm [shape: f32[16,32], index: 8, kind: output, shape index: {1}]  }
   0x1   :  { %4592 = sst [smem:[#allocation12_spill]] %s4588_s5 }
   0x2   :  { %14 = vsyncpa [#allocation4], 0 }
   0x3   :  { %15 = vsyncpa [#allocation5], 0 }
   0x4   :  { %17 = vsyncpa [#allocation5 + $0x1], 0 }
   0x5   :  { %18 = vsyncpa [#allocation8], 0 }
   0x6   :  { %20 = vsyncpa [#allocation8 + $0x1], 0  ;;  %s4305_s27 = smov 0   ;;  %s4307_s28 = smov 0  }
   0x7   :  { %s4309_s29 = smov 0   ;;  %s4311_s30 = smov 0  }
   0x8   :  { %s4313_s9 = smov 0   ;;  %s4315_s10 = smov 0  }
   0x9 LB: > { %s2685_s11 = sadd.s32 4294967295, %s4255_s10   ;;  %s2686_s12 = sadd.s32 4294967294, %s4255_s10   ;;  %s4255_s10 = sphi %s4315_s10, %s26_s10   ;;  %s4251_s9 = sphi %s4313_s9, %s4600_s9   ;;  %s4247_s30 = sphi %s4311_s30, %s4599_s30   ;;  %s4243_s29 = sphi %s4309_s29, %s4598_s29   ;;  %s4239_s28 = sphi %s4307_s28, %s4597_s28   ;;  %s4235_s27 = sphi %s4305_s27, %s4596_s27  }
   0xa   : > { %s38_s13 = sadd.s32 1, %s4251_s9  ;;  %s199_s14 = sadd.s32 1, %s4243_s29 }
   0xb   : > { %p40_p0 = scmp.ge.s32.totalorder %s38_s13, 2  ;;  %p209_p1 = scmp.ne.s32.totalorder %s4243_s29, %s4239_s28 }
   0xc   : > { %p210_p2 = scmp.eq.s32.totalorder %s2685_s11, 1  ;;  %p215_p3 = scmp.ne.s32.totalorder %s4239_s28, %s4235_s27 }
   0xd   : > { %s4602_s13 = smov (%p40_p0, %s38_s13), 0  ;;  %p216_p5 = scmp.eq.s32.totalorder %s2686_s12, 1 }
   0xe   : > { %p4345_p4 = por %p210_p2, %p209_p1  ;;  %s194_s16 = ssub.s32 %s4251_s9, %s4602_s13 }
   0xf   : > { %p2687_p6 = scmp.ge.s32.totalorder %s4255_s10, 1  ;;  %p197_p7 = scmp.eq.s32.totalorder %s194_s16, 0 }
  0x10   : > { %p4352_p8 = por %p216_p5, %p215_p3  ;;  %p249_p9 = scmp.lt.s32.totalorder %s4255_s10, 3 }
  0x11   : > { %s4358_s18 = scalar_select %p197_p7, %s4243_s29, %s199_s14  }
  0x12   : > { %p250_p10 = pnand %p2687_p6, %p249_p9  ;;  %p4053_p11 = scmp.eq.s32.totalorder %s2685_s11, 0 }
  0x13   : > { %s4595_s5 = sld [smem:[#allocation12_spill]]  ;;  %s4257_s22 = smov [#allocation3]  }
  0x14   : > { %p4042_p12 = pneg %p250_p10  ;;  %s274_s23 = sshll.u32 %s4257_s22, 4  ;;  %s275_s23 = int_to_ptr.vmem [resolvable:$true] %s274_s23 }
  0x15   : > { %s4258_s24 = smov 2048   ;;  %s4259_s25 = smov 128  }
  0x16   : > { %p4043_p13 = pnand %p4053_p11, %p4042_p12  ;;  %300 = sbr.rel (%p250_p10) target bundleno = 547 (0x223), region = 48 }
  0x19   : > { %s272_s21 = sshll.u32 %s4595_s5, 4  ;;  %s273_s21 = int_to_ptr.hbm [resolvable:$true] %s272_s21 }
  0x1a   : > { %4045 = dma.hbm_to_vmem [thread:$0]  (!%p4043_p13), %s273_s21, 32768, %s275_s23, [#allocation4], %s4258_s24, %s4258_s24, %s4259_s25  }
  0x1b   : > { %4222 = dma.done.wait (%p4053_p11), [#allocation4], 32768  }
  0x1c   : > { %4224 = vsyncadd (%p4053_p11), [#allocation4], 4294934528  ;;  %p339_p0 = scmp.lt.s32.totalorder %s4247_s30, 1  ;;  %v3768_v0 = vld [vmem:[%s4584_s1 + $0x8] sm:$0xff]  ;;  %v3767_v1 = vld [vmem:[%s4584_s1] sm:$0xff]  ;;  %vm367_vm0 = vcmask 261120  }
  0x1d   : > { %v3776_v3 = vld [vmem:[%s4586_s3 + $0x38] sm:$0xff]  ;;  %v3634_v4 = vld [vmem:[#allocation3 + $0x700] sm:$0xf]  ;;  %377 = vmatpush.bf16.msra.mxu0 %v3768_v0  ;;  %v4001_v7 = vld [vmem:[#allocation3 + $0x704] sm:$0xf]  ;;  %s4161_s12 = scalar_lea.hbm %s4591_s8, 16 }
  0x1e   : > { %s340_s26 = scalar_select %p339_p0, %s4247_s30, 1  ;;  %v4017_v5 = vld [vmem:[#allocation3 + $0x77c] sm:$0xf0]  ;;  %v3636_v8 = vld [vmem:[#allocation3 + $0x780] sm:$0xf0]  ;;  %462 = vmatpush.bf16.msra.mxu1 %v3776_v3  ;;  %v3775_v12 = vld [vmem:[%s4586_s3 + $0x30] sm:$0xff] }
  0x1f   : > { %v3635_v6 = vor.u32 %v4017_v5, %v3634_v4  ;;  %v3642_v9 = vld [vmem:[#allocation3 + $0x708] sm:$0xf]  ;;  %v3639_v10 = vor.u32 %v4001_v7, %v3636_v8  ;;  %v3506_v13 = vld [vmem:[#allocation3 + $0x600] sm:$0xf]  ;;  %v3969_v16 = vld [vmem:[#allocation3 + $0x604] sm:$0xf] }
  0x20   : > { %s2694_s11 = sshll.u32 %s340_s26, 3  ;;  %v4018_v11 = vld [vmem:[#allocation3 + $0x784] sm:$0xf0]  ;;  %v3985_v15 = vld [vmem:[#allocation3 + $0x67c] sm:$0xf0]  ;;  %v3772_v48 = vld [vmem:[%s4586_s3 + $0x18] sm:$0xff] }
  0x21   : > { %s342_s16 = scalar_lea.vmem %s4583_s0, %s2694_s11  ;;  %2084 = vmatpush.bf16.msra.mxu2 %v3635_v6  ;;  %v3643_v14 = vor.u32 %v4018_v11, %v3642_v9  ;;  %v3508_v17 = vld [vmem:[#allocation3 + $0x680] sm:$0xf0]  ;;  %2097 = vmatpush.bf16.msra.mxu3 %v3639_v10  ;;  %v3507_v19 = vor.u32 %v3985_v15, %v3506_v13  ;;  %v3514_v21 = vld [vmem:[#allocation3 + $0x608] sm:$0xf]  ;;  %v3378_v23 = vld [vmem:[#allocation3 + $0x500] sm:$0xf] }
  0x22   : > { %v345_v2 = vld [vmem:[%s342_s16] sm:$0xff]  ;;  %v3511_v20 = vor.u32 %v3969_v16, %v3508_v17  ;;  %v3986_v22 = vld [vmem:[#allocation3 + $0x684] sm:$0xf0]  ;;  %378 = vmatpush.bf16.msra.mxu0 %v3767_v1  ;;  %463 = vmatpush.bf16.msra.mxu1 %v3775_v12  ;;  %v3771_v58 = vld [vmem:[%s4586_s3 + $0x10] sm:$0xff]  ;;  %s4425_s26 = sand.u32 1, %s4239_s28   ;;  %s3764_s11 = sshll.u32 %s4247_s30, 3 }
  0x23   : > { %v346_v18 = vpack.c.bf16 %v345_v2, %v345_v2  ;;  %v3953_v24 = vld [vmem:[#allocation3 + $0x57c] sm:$0xf0]  ;;  %v3937_v25 = vld [vmem:[#allocation3 + $0x504] sm:$0xf]  ;;  %v3515_v26 = vor.u32 %v3986_v22, %v3514_v21  ;;  %v3774_v27 = vld [vmem:[%s4586_s3 + $0x28] sm:$0xff]  ;;  %s2692_s14 = sshll.u32 %s4425_s26, 8 }
  0x24   : > { %v3380_v28 = vld [vmem:[#allocation3 + $0x580] sm:$0xf0]  ;;  %v3379_v29 = vor.u32 %v3953_v24, %v3378_v23  ;;  %v3386_v30 = vld [vmem:[#allocation3 + $0x508] sm:$0xf]  ;;  %v3250_v33 = vld [vmem:[#allocation3 + $0x400] sm:$0xf] }
  0x25   : > { %2085 = vmatpush.bf16.msra.mxu2 %v3507_v19  ;;  %v3954_v31 = vld [vmem:[#allocation3 + $0x584] sm:$0xf0]  ;;  %2703 = vmatmul.msk.bf16.vlgmr.msra.gmra.mxu0 %vm367_vm0, %v346_v18  ;;  %v3383_v32 = vor.u32 %v3937_v25, %v3380_v28  ;;  %v3921_v34 = vld [vmem:[#allocation3 + $0x47c] sm:$0xf0]  ;;  %v3905_v35 = vld [vmem:[#allocation3 + $0x404] sm:$0xf] }
  0x26   : > { %2110 = vmatpush.bf16.msrb.mxu0 %v3643_v14  ;;  %2098 = vmatpush.bf16.msra.mxu3 %v3511_v20  ;;  %v3252_v36 = vld [vmem:[#allocation3 + $0x480] sm:$0xf0]  ;;  %v3387_v37 = vor.u32 %v3954_v31, %v3386_v30  ;;  %v3251_v39 = vor.u32 %v3921_v34, %v3250_v33  ;;  %v3258_v40 = vld [vmem:[#allocation3 + $0x408] sm:$0xf]  ;;  %v3122_v43 = vld [vmem:[#allocation3 + $0x300] sm:$0xf] }
  0x27   : > { %464 = vmatpush.bf16.msra.mxu1 %v3774_v27  ;;  %v3773_v38 = vld [vmem:[%s4586_s3 + $0x20] sm:$0xff]  ;;  %v3922_v41 = vld [vmem:[#allocation3 + $0x484] sm:$0xf0]  ;;  %v3255_v42 = vor.u32 %v3905_v35, %v3252_v36  ;;  %v4002_v12 = vld [vmem:[#allocation3 + $0x70c] sm:$0xf]  ;;  %s2693_s16 = sshll.u32 %s4425_s26, 3 }
  0x28   : > { %v3889_v44 = vld [vmem:[#allocation3 + $0x37c] sm:$0xf0]  ;;  %v3873_v45 = vld [vmem:[#allocation3 + $0x304] sm:$0xf]  ;;  %v3259_v47 = vor.u32 %v3922_v41, %v3258_v40  ;;  %v3130_v50 = vld [vmem:[#allocation3 + $0x308] sm:$0xf] }
  0x29   : > { %2086 = vmatpush.bf16.msra.mxu2 %v3379_v29  ;;  %v3124_v46 = vld [vmem:[#allocation3 + $0x380] sm:$0xf0]  ;;  %v3123_v49 = vor.u32 %v3889_v44, %v3122_v43  ;;  %v3890_v51 = vld [vmem:[#allocation3 + $0x384] sm:$0xf0]  ;;  %v2994_v53 = vld [vmem:[#allocation3 + $0x200] sm:$0xf] }
  0x2a   : > { %2111 = vmatpush.bf16.msrb.mxu0 %v3515_v26  ;;  %2099 = vmatpush.bf16.msra.mxu3 %v3383_v32  ;;  %v3127_v52 = vor.u32 %v3873_v45, %v3124_v46  ;;  %v3857_v54 = vld [vmem:[#allocation3 + $0x27c] sm:$0xf0]  ;;  %v3841_v55 = vld [vmem:[#allocation3 + $0x204] sm:$0xf]  ;;  %v3131_v57 = vor.u32 %v3890_v51, %v3130_v50  ;;  %v3002_v60 = vld [vmem:[#allocation3 + $0x208] sm:$0xf] }
  0x2b   : > { %465 = vmatpush.bf16.msra.mxu1 %v3773_v38  ;;  %v2996_v56 = vld [vmem:[#allocation3 + $0x280] sm:$0xf0]  ;;  %v2995_v59 = vor.u32 %v3857_v54, %v2994_v53  ;;  %v3858_v61 = vld [vmem:[#allocation3 + $0x284] sm:$0xf0]  ;;  %v2866_v63 = vld [vmem:[#allocation3 + $0x100] sm:$0xf] }
  0x2c   : > { %v2999_v62 = vor.u32 %v3841_v55, %v2996_v56  ;;  %v3825_v0 = vld [vmem:[#allocation3 + $0x17c] sm:$0xf0]  ;;  %v3809_v1 = vld [vmem:[#allocation3 + $0x104] sm:$0xf]  ;;  %v3003_v3 = vor.u32 %v3858_v61, %v3002_v60  ;;  %v3770_v4 = vld [vmem:[%s4586_s3 + $0x8] sm:$0xff]  ;;  %s4445_s22 = scalar_lea.vmem [#allocation7], %s2693_s16  ;;  %s2565_s16 = scalar_lea.hbm %s4591_s8, %s3764_s11 }
  0x2d   : > { %2087 = vmatpush.bf16.msra.mxu2 %v3251_v39  ;;  %v2868_v2 = vld [vmem:[#allocation3 + $0x180] sm:$0xf0]  ;;  %v2874_v5 = vld [vmem:[#allocation3 + $0x108] sm:$0xf]  ;;  %v2867_v6 = vor.u32 %v3825_v0, %v2866_v63  ;;  %v2738_v8 = vld [vmem:[#allocation3] sm:$0xf] }
  0x2e   : > { %2112 = vmatpush.bf16.msrb.mxu0 %v3387_v37  ;;  %2100 = vmatpush.bf16.msra.mxu3 %v3255_v42  ;;  %v3826_v7 = vld [vmem:[#allocation3 + $0x184] sm:$0xf0]  ;;  %v3793_v9 = vld [vmem:[#allocation3 + $0x7c] sm:$0xf0]  ;;  %v2871_v10 = vor.u32 %v3809_v1, %v2868_v2  ;;  %v3777_v11 = vld [vmem:[#allocation3 + $0x4] sm:$0xf] }
  0x2f   : > { %466 = vmatpush.bf16.msra.mxu1 %v3772_v48  ;;  %v3644_v13 = vld [vmem:[#allocation3 + $0x788] sm:$0xf0]  ;;  %v2740_v14 = vld [vmem:[#allocation3 + $0x80] sm:$0xf0]  ;;  %v3650_v15 = vld [vmem:[#allocation3 + $0x710] sm:$0xf]  ;;  %v2875_v17 = vor.u32 %v3826_v7, %v2874_v5  ;;  %v2739_v21 = vor.u32 %v3793_v9, %v2738_v8 }
  0x30   : > { %v4019_v16 = vld [vmem:[#allocation3 + $0x78c] sm:$0xf0]  ;;  %v3769_v18 = vld [vmem:[%s4586_s3] sm:$0xff]  ;;  %v4003_v19 = vld [vmem:[#allocation3 + $0x714] sm:$0xf]  ;;  %v3647_v24 = vor.u32 %v4002_v12, %v3644_v13  ;;  %v2743_v25 = vor.u32 %v3777_v11, %v2740_v14  ;;  %s4451_s21 = scalar_lea.vmem [#allocation6], %s2692_s14 }
  0x31   : > { %2088 = vmatpush.bf16.msra.mxu2 %v3123_v49  ;;  %v3652_v20 = vld [vmem:[#allocation3 + $0x790] sm:$0xf0]  ;;  %v2746_v22 = vld [vmem:[#allocation3 + $0x8] sm:$0xf]  ;;  %v3651_v26 = vor.u32 %v4019_v16, %v3650_v15  ;;  %v3658_v27 = vld [vmem:[#allocation3 + $0x718] sm:$0xf] }
  0x32   : > { %2113 = vmatpush.bf16.msrb.mxu0 %v3259_v47  ;;  %2101 = vmatpush.bf16.msra.mxu3 %v3127_v52  ;;  %v3794_v23 = vld [vmem:[#allocation3 + $0x84] sm:$0xf0]  ;;  %v4020_v28 = vld [vmem:[#allocation3 + $0x794] sm:$0xf0]  ;;  %v3655_v29 = vor.u32 %v4003_v19, %v3652_v20  ;;  %v3970_v32 = vld [vmem:[#allocation3 + $0x60c] sm:$0xf] }
  0x33   : > { %467 = vmatpush.bf16.msra.mxu1 %v3771_v58  ;;  %v2747_v30 = vor.u32 %v3794_v23, %v2746_v22  ;;  %v3659_v31 = vor.u32 %v4020_v28, %v3658_v27  ;;  %v3516_v33 = vld [vmem:[#allocation3 + $0x688] sm:$0xf0]  ;;  %v3522_v34 = vld [vmem:[#allocation3 + $0x610] sm:$0xf]  ;;  %v3971_v37 = vld [vmem:[#allocation3 + $0x614] sm:$0xf] }
  0x34   : > { %v3519_v35 = vor.u32 %v3970_v32, %v3516_v33  ;;  %v3987_v36 = vld [vmem:[#allocation3 + $0x68c] sm:$0xf0]  ;;  %v3524_v38 = vld [vmem:[#allocation3 + $0x690] sm:$0xf0]  ;;  %v3530_v41 = vld [vmem:[#allocation3 + $0x618] sm:$0xf] }
  0x35   : > { %2089 = vmatpush.bf16.msra.mxu2 %v2995_v59  ;;  %v3523_v39 = vor.u32 %v3987_v36, %v3522_v34  ;;  %v3527_v40 = vor.u32 %v3971_v37, %v3524_v38  ;;  %v3988_v42 = vld [vmem:[#allocation3 + $0x694] sm:$0xf0]  ;;  %v3938_v44 = vld [vmem:[#allocation3 + $0x50c] sm:$0xf]  ;;  %v3394_v46 = vld [vmem:[#allocation3 + $0x510] sm:$0xf] }
  0x36   : > { %2114 = vmatpush.bf16.msrb.mxu0 %v3131_v57  ;;  %2102 = vmatpush.bf16.msra.mxu3 %v2999_v62  ;;  %v3531_v43 = vor.u32 %v3988_v42, %v3530_v41  ;;  %v3388_v45 = vld [vmem:[#allocation3 + $0x588] sm:$0xf0]  ;;  %v3955_v48 = vld [vmem:[#allocation3 + $0x58c] sm:$0xf0]  ;;  %v3939_v49 = vld [vmem:[#allocation3 + $0x514] sm:$0xf] }
  0x37   : > { %468 = vmatpush.bf16.msra.mxu1 %v3770_v4  ;;  %v3391_v47 = vor.u32 %v3938_v44, %v3388_v45  ;;  %v3396_v50 = vld [vmem:[#allocation3 + $0x590] sm:$0xf0]  ;;  %v3395_v51 = vor.u32 %v3955_v48, %v3394_v46  ;;  %v3402_v53 = vld [vmem:[#allocation3 + $0x518] sm:$0xf]  ;;  %v3906_v56 = vld [vmem:[#allocation3 + $0x40c] sm:$0xf] }
  0x38   : > { %v3399_v52 = vor.u32 %v3939_v49, %v3396_v50  ;;  %v3956_v54 = vld [vmem:[#allocation3 + $0x594] sm:$0xf0]  ;;  %v3260_v57 = vld [vmem:[#allocation3 + $0x488] sm:$0xf0]  ;;  %v3266_v58 = vld [vmem:[#allocation3 + $0x410] sm:$0xf] }
  0x39   : > { %2090 = vmatpush.bf16.msra.mxu2 %v2867_v6  ;;  %v3403_v55 = vor.u32 %v3956_v54, %v3402_v53  ;;  %v3263_v59 = vor.u32 %v3906_v56, %v3260_v57  ;;  %v3923_v60 = vld [vmem:[#allocation3 + $0x48c] sm:$0xf0]  ;;  %v3907_v61 = vld [vmem:[#allocation3 + $0x414] sm:$0xf]  ;;  %v3274_v1 = vld [vmem:[#allocation3 + $0x418] sm:$0xf] }
  0x3a   : > { %2115 = vmatpush.bf16.msrb.mxu0 %v3003_v3  ;;  %2103 = vmatpush.bf16.msra.mxu3 %v2871_v10  ;;  %v3268_v62 = vld [vmem:[#allocation3 + $0x490] sm:$0xf0]  ;;  %v3267_v63 = vor.u32 %v3923_v60, %v3266_v58  ;;  %v3924_v2 = vld [vmem:[#allocation3 + $0x494] sm:$0xf0]  ;;  %v3874_v4 = vld [vmem:[#allocation3 + $0x30c] sm:$0xf] }
  0x3b   : > { %469 = vmatpush.bf16.msra.mxu1 %v3769_v18  ;;  %v3271_v0 = vor.u32 %v3907_v61, %v3268_v62  ;;  %v3275_v3 = vor.u32 %v3924_v2, %v3274_v1  ;;  %v3132_v5 = vld [vmem:[#allocation3 + $0x388] sm:$0xf0]  ;;  %v3138_v6 = vld [vmem:[#allocation3 + $0x310] sm:$0xf]  ;;  %v3875_v9 = vld [vmem:[#allocation3 + $0x314] sm:$0xf] }
  0x3c   : > { %v3135_v7 = vor.u32 %v3874_v4, %v3132_v5  ;;  %v3891_v8 = vld [vmem:[#allocation3 + $0x38c] sm:$0xf0]  ;;  %v3140_v10 = vld [vmem:[#allocation3 + $0x390] sm:$0xf0]  ;;  %v3146_v13 = vld [vmem:[#allocation3 + $0x318] sm:$0xf] }
  0x3d   : > { %2091 = vmatpush.bf16.msra.mxu2 %v2739_v21  ;;  %v3139_v11 = vor.u32 %v3891_v8, %v3138_v6  ;;  %v3143_v12 = vor.u32 %v3875_v9, %v3140_v10  ;;  %v3892_v14 = vld [vmem:[#allocation3 + $0x394] sm:$0xf0]  ;;  %v3842_v16 = vld [vmem:[#allocation3 + $0x20c] sm:$0xf]  ;;  %v3010_v18 = vld [vmem:[#allocation3 + $0x210] sm:$0xf] }
  0x3e   : > { %2116 = vmatpush.bf16.msrb.mxu0 %v2875_v17  ;;  %2104 = vmatpush.bf16.msra.mxu3 %v2743_v25  ;;  %v3147_v15 = vor.u32 %v3892_v14, %v3146_v13  ;;  %v3004_v17 = vld [vmem:[#allocation3 + $0x288] sm:$0xf0]  ;;  %v3859_v20 = vld [vmem:[#allocation3 + $0x28c] sm:$0xf0]  ;;  %v3843_v21 = vld [vmem:[#allocation3 + $0x214] sm:$0xf] }
  0x3f   : > { %2123 = vmatpush.bf16.msrb.mxu1 %v3647_v24  ;;  %v3007_v19 = vor.u32 %v3842_v16, %v3004_v17  ;;  %v3012_v22 = vld [vmem:[#allocation3 + $0x290] sm:$0xf0]  ;;  %v3011_v23 = vor.u32 %v3859_v20, %v3010_v18  ;;  %v3018_v25 = vld [vmem:[#allocation3 + $0x218] sm:$0xf]  ;;  %v3810_v28 = vld [vmem:[#allocation3 + $0x10c] sm:$0xf] }
  0x40   : > { %v3015_v24 = vor.u32 %v3843_v21, %v3012_v22  ;;  %v3827_v32 = vld [vmem:[#allocation3 + $0x18c] sm:$0xf0]  ;;  %v3811_v33 = vld [vmem:[#allocation3 + $0x114] sm:$0xf]  ;;  %v2890_v37 = vld [vmem:[#allocation3 + $0x118] sm:$0xf] }
  0x41   : > { %2136 = vmatpush.bf16.msrb.mxu2 %v3651_v26  ;;  %v3860_v26 = vld [vmem:[#allocation3 + $0x294] sm:$0xf0]  ;;  %v2884_v34 = vld [vmem:[#allocation3 + $0x190] sm:$0xf0]  ;;  %v2748_v41 = vld [vmem:[#allocation3 + $0x88] sm:$0xf0] }
  0x42   : > { %2149 = vmatpush.bf16.msrb.mxu3 %v3655_v29  ;;  %2117 = vmatpush.bf16.msrb.mxu0 %v2747_v30  ;;  %v3019_v27 = vor.u32 %v3860_v26, %v3018_v25  ;;  %v2876_v29 = vld [vmem:[#allocation3 + $0x188] sm:$0xf0]  ;;  %v2882_v30 = vld [vmem:[#allocation3 + $0x110] sm:$0xf]  ;;  %v2887_v36 = vor.u32 %v3811_v33, %v2884_v34  ;;  %v3828_v38 = vld [vmem:[#allocation3 + $0x194] sm:$0xf0] }
  0x43   : > { %2124 = vmatpush.bf16.msrb.mxu1 %v3519_v35  ;;  %v2883_v35 = vor.u32 %v3827_v32, %v2882_v30  ;;  %v2754_v42 = vld [vmem:[#allocation3 + $0x10] sm:$0xf]  ;;  %v3779_v45 = vld [vmem:[#allocation3 + $0x14] sm:$0xf]  ;;  %v2762_v49 = vld [vmem:[#allocation3 + $0x18] sm:$0xf] }
  0x44   : > { %v3795_v44 = vld [vmem:[#allocation3 + $0x8c] sm:$0xf0]  ;;  %v2756_v46 = vld [vmem:[#allocation3 + $0x90] sm:$0xf0]  ;;  %v3796_v50 = vld [vmem:[#allocation3 + $0x94] sm:$0xf0] }
  0x45   : > { %2137 = vmatpush.bf16.msrb.mxu2 %v3523_v39  ;;  %v2891_v39 = vor.u32 %v3828_v38, %v2890_v37  ;;  %v2759_v48 = vor.u32 %v3779_v45, %v2756_v46  ;;  %v3660_v1 = vld [vmem:[#allocation3 + $0x798] sm:$0xf0]  ;;  %v3666_v2 = vld [vmem:[#allocation3 + $0x720] sm:$0xf]  ;;  %v4005_v4 = vld [vmem:[#allocation3 + $0x724] sm:$0xf] }
  0x46   : > { %2162 = vmatpush.bf16.msra.mxu0 %v3659_v31  ;;  %2150 = vmatpush.bf16.msrb.mxu3 %v3527_v40  ;;  %v2879_v31 = vor.u32 %v3810_v28, %v2876_v29  ;;  %v3778_v40 = vld [vmem:[#allocation3 + $0xc] sm:$0xf]  ;;  %v3668_v6 = vld [vmem:[#allocation3 + $0x7a0] sm:$0xf0]  ;;  %v4022_v8 = vld [vmem:[#allocation3 + $0x7a4] sm:$0xf0] }
  0x47   : > { %2125 = vmatpush.bf16.msrb.mxu1 %v3391_v47  ;;  %v2755_v47 = vor.u32 %v3795_v44, %v2754_v42  ;;  %v3532_v13 = vld [vmem:[#allocation3 + $0x698] sm:$0xf0]  ;;  %v3671_v14 = vor.u32 %v4005_v4, %v3668_v6  ;;  %v3538_v16 = vld [vmem:[#allocation3 + $0x620] sm:$0xf]  ;;  %v3973_v18 = vld [vmem:[#allocation3 + $0x624] sm:$0xf] }
  0x48   : > { %v3989_v17 = vld [vmem:[#allocation3 + $0x69c] sm:$0xf0]  ;;  %v3546_v20 = vld [vmem:[#allocation3 + $0x628] sm:$0xf]  ;;  %v3404_v25 = vld [vmem:[#allocation3 + $0x598] sm:$0xf0] }
  0x49   : > { %2138 = vmatpush.bf16.msrb.mxu2 %v3395_v51  ;;  %v2763_v51 = vor.u32 %v3796_v50, %v2762_v49  ;;  %v3990_v21 = vld [vmem:[#allocation3 + $0x6a4] sm:$0xf0]  ;;  %v3410_v28 = vld [vmem:[#allocation3 + $0x520] sm:$0xf]  ;;  %v3941_v30 = vld [vmem:[#allocation3 + $0x524] sm:$0xf] }
  0x4a   : > { %2163 = vmatpush.bf16.msra.mxu0 %v3531_v43  ;;  %2151 = vmatpush.bf16.msrb.mxu3 %v3399_v52  ;;  %v2751_v43 = vor.u32 %v3778_v40, %v2748_v41  ;;  %v4107_v52 = vld [vmem:[%s4585_s2] ss:$0 sm:$0xff]  ;;  %v3418_v32 = vld [vmem:[#allocation3 + $0x528] sm:$0xf]  ;;  %v3276_v37 = vld [vmem:[#allocation3 + $0x498] sm:$0xf0] }
  0x4b   : > { %2126 = vmatpush.bf16.msrb.mxu1 %v3263_v59  ;;  %v3957_v29 = vld [vmem:[#allocation3 + $0x59c] sm:$0xf0]  ;;  %v3958_v33 = vld [vmem:[#allocation3 + $0x5a4] sm:$0xf0]  ;;  %v3909_v42 = vld [vmem:[#allocation3 + $0x424] sm:$0xf] }
  0x4c   : > { %v3282_v40 = vld [vmem:[#allocation3 + $0x420] sm:$0xf]  ;;  %v3290_v44 = vld [vmem:[#allocation3 + $0x428] sm:$0xf]  ;;  %v3148_v49 = vld [vmem:[#allocation3 + $0x398] sm:$0xf0] }
  0x4d   : > { %2139 = vmatpush.bf16.msrb.mxu2 %v3267_v63  ;;  %v3925_v41 = vld [vmem:[#allocation3 + $0x49c] sm:$0xf0]  ;;  %v3926_v45 = vld [vmem:[#allocation3 + $0x4a4] sm:$0xf0]  ;;  %s2567_s19 = sshll.u32 %s4445_s22, 4  ;;  %s2569_s20 = sshll.u32 %s2565_s16, 4  ;;  %s2568_s19 = int_to_ptr.vmem [resolvable:$true] %s2567_s19  ;;  %s2570_s20 = int_to_ptr.hbm [resolvable:$true] %s2569_s20 }
  0x4e   : > { %2164 = vmatpush.bf16.msra.mxu0 %v3403_v55  ;;  %2152 = vmatpush.bf16.msrb.mxu3 %v3271_v0  ;;  %v4004_v0 = vld [vmem:[#allocation3 + $0x71c] sm:$0xf]  ;;  %v3034_v4 = vld [vmem:[#allocation3 + $0x228] sm:$0xf]  ;;  %s2538_s23 = scalar_lea.sflag [#allocation8], %s4425_s26  ;;  %s4155_s24 = sshra.s32 %s2570_s20, 4  ;;  %s4156_s24 = int_to_ptr.hbm [resolvable:$true] %s4155_s24 }
  0x4f   : > { %2127 = vmatpush.bf16.msrb.mxu1 %v3135_v7  ;;  %v3674_v7 = vld [vmem:[#allocation3 + $0x728] sm:$0xf]  ;;  %v3663_v10 = vor.u32 %v4004_v0, %v3660_v1  ;;  %v3026_v0 = vld [vmem:[#allocation3 + $0x220] sm:$0xf]  ;;  %s4157_s25 = scalar_lea.hbm %s4156_s24, 8  ;;  %p4162_p5 = scmp.lt.s32.totalorder %s4156_s24, %s4591_s8 }
  0x50   : > { %v3861_v1 = vld [vmem:[#allocation3 + $0x29c] sm:$0xf0]  ;;  %p4158_p1 = scmp.ne.s32.totalorder %s4156_s24, %s4157_s25  ;;  %p4163_p6 = scmp.lt.s32.totalorder %s4161_s12, %s4157_s25 }
  0x51   : > { %2140 = vmatpush.bf16.msrb.mxu2 %v3139_v11 }
  0x52   : > { %2165 = vmatpush.bf16.msra.mxu0 %v3275_v3  ;;  %2153 = vmatpush.bf16.msrb.mxu3 %v3143_v12  ;;  %v4021_v3 = vld [vmem:[#allocation3 + $0x79c] sm:$0xf0]  ;;  %v3972_v12 = vld [vmem:[#allocation3 + $0x61c] sm:$0xf]  ;;  %p4159_p2 = pnand %p4158_p1, %p4345_p4  ;;  %p4164_p7 = por %p4163_p6, %p4162_p5 }
  0x53   : > { %2128 = vmatpush.bf16.msrb.mxu1 %v3007_v19  ;;  %v3667_v11 = vor.u32 %v4021_v3, %v3666_v2  ;;  %v3540_v19 = vld [vmem:[#allocation3 + $0x6a0] sm:$0xf0]  ;;  %v3535_v22 = vor.u32 %v3972_v12, %v3532_v13  ;;  %v2898_v13 = vld [vmem:[#allocation3 + $0x120] sm:$0xf] }
  0x54   : > { %v3543_v26 = vor.u32 %v3973_v18, %v3540_v19  ;;  %v3845_v2 = vld [vmem:[#allocation3 + $0x224] sm:$0xf]  ;;  %v3830_v18 = vld [vmem:[#allocation3 + $0x1a4] sm:$0xf0]  ;;  %v3780_v19 = vld [vmem:[#allocation3 + $0x1c] sm:$0xf]  ;;  %p4160_p3 = pneg %p4159_p2 }
  0x55   : > { %2141 = vmatpush.bf16.msrb.mxu2 %v3011_v23  ;;  %v3539_v23 = vor.u32 %v3989_v17, %v3538_v16  ;;  %v3028_v3 = vld [vmem:[#allocation3 + $0x2a0] sm:$0xf0]  ;;  %v2906_v17 = vld [vmem:[#allocation3 + $0x128] sm:$0xf] }
  0x56   : > { %2166 = vmatpush.bf16.msra.mxu0 %v3147_v15  ;;  %2154 = vmatpush.bf16.msrb.mxu3 %v3015_v24  ;;  %v3675_v15 = vor.u32 %v4022_v8, %v3674_v7  ;;  %v3940_v24 = vld [vmem:[#allocation3 + $0x51c] sm:$0xf]  ;;  %v3027_v7 = vor.u32 %v3861_v1, %v3026_v0  ;;  %v2900_v16 = vld [vmem:[#allocation3 + $0x1a0] sm:$0xf0]  ;;  %v3428_v0 = vld [vmem:[#allocation3 + $0x5b0] sm:$0xf0]  ;;  %p4165_p9 = pnand %p4164_p7, %p4160_p3 }
  0x57   : > { %2129 = vmatpush.bf16.msrb.mxu1 %v2879_v31  ;;  %v3412_v31 = vld [vmem:[#allocation3 + $0x5a0] sm:$0xf0]  ;;  %v3407_v34 = vor.u32 %v3940_v24, %v3404_v25  ;;  %v3812_v8 = vld [vmem:[#allocation3 + $0x11c] sm:$0xf]  ;;  %v3797_v24 = vld [vmem:[#allocation3 + $0x9c] sm:$0xf0] }
  0x58   : > { %v3415_v38 = vor.u32 %v3941_v30, %v3412_v31  ;;  %v3798_v30 = vld [vmem:[#allocation3 + $0xa4] sm:$0xf0]  ;;  %v4006_v31 = vld [vmem:[#allocation3 + $0x72c] sm:$0xf]  ;;  %v3434_v1 = vld [vmem:[#allocation3 + $0x538] sm:$0xf] }
  0x59   : > { %2142 = vmatpush.bf16.msrb.mxu2 %v2883_v35  ;;  %v3411_v35 = vor.u32 %v3957_v29, %v3410_v28  ;;  %v2772_v28 = vld [vmem:[#allocation3 + $0xa0] sm:$0xf0]  ;;  %v2778_v29 = vld [vmem:[#allocation3 + $0x28] sm:$0xf] }
  0x5a   : > { %2167 = vmatpush.bf16.msra.mxu0 %v3019_v27  ;;  %2155 = vmatpush.bf16.msrb.mxu3 %v2887_v36  ;;  %v3547_v27 = vor.u32 %v3990_v21, %v3546_v20  ;;  %v3908_v36 = vld [vmem:[#allocation3 + $0x41c] sm:$0xf] }
  0x5b   : > { %2130 = vmatpush.bf16.msrb.mxu1 %v2751_v43  ;;  %v3284_v43 = vld [vmem:[#allocation3 + $0x4a0] sm:$0xf0]  ;;  %v3279_v46 = vor.u32 %v3908_v36, %v3276_v37 }
  0x5c   : > { %v3287_v50 = vor.u32 %v3909_v42, %v3284_v43  ;;  %v2779_v42 = vor.u32 %v3798_v30, %v2778_v29  ;;  %v3846_v30 = vld [vmem:[#allocation3 + $0x22c] sm:$0xf] }
  0x5d   : > { %2143 = vmatpush.bf16.msrb.mxu2 %v2755_v47  ;;  %v3283_v47 = vor.u32 %v3925_v41, %v3282_v40  ;;  %v4024_v40 = vld [vmem:[#allocation3 + $0x7b4] sm:$0xf0] }
  0x5e   : > { %2168 = vmatpush.bf16.msra.mxu0 %v2891_v39  ;;  %2156 = vmatpush.bf16.msrb.mxu3 %v2759_v48  ;;  %v3419_v39 = vor.u32 %v3958_v33, %v3418_v32  ;;  %v3876_v48 = vld [vmem:[#allocation3 + $0x31c] sm:$0xf]  ;;  %v3676_v32 = vld [vmem:[#allocation3 + $0x7a8] sm:$0xf0]  ;;  %v3682_v33 = vld [vmem:[#allocation3 + $0x730] sm:$0xf] }
  0x5f   : > { %v3679_v43 = vor.u32 %v4006_v31, %v3676_v32  ;;  %v3036_v31 = vld [vmem:[#allocation3 + $0x2a8] sm:$0xf0] }
  0x62   : > { %2169 = vmatpush.bf16.msra.mxu0 %v2763_v51  ;;  %v3291_v51 = vor.u32 %v3926_v45, %v3290_v44  ;;  %v3974_v45 = vld [vmem:[#allocation3 + $0x62c] sm:$0xf] }
  0xa2   : > { %v380_v53 = vpop.f32.mrf.mxu0 }
  0xa3   : > { %v381_v54 = vadd.f32 %v4107_v52, %v380_v53  ;;  %v3154_v52 = vld [vmem:[#allocation3 + $0x320] sm:$0xf] }
  0xa4   : > { %v3893_v53 = vld [vmem:[#allocation3 + $0x39c] sm:$0xf0] }
  0xa5   : > { %v385_v55 = vmul.f32 0.044715, %v381_v54  ;;  %v384_v62 = vmul.f32 0.5, %v381_v54 }
  0xa7   : > { %v386_v56 = vmul.f32 %v385_v55, %v381_v54  ;;  %v3156_v55 = vld [vmem:[#allocation3 + $0x3a0] sm:$0xf0] }
  0xa9   : > { %v387_v57 = vmul.f32 %v386_v56, %v381_v54  ;;  %v3162_v56 = vld [vmem:[#allocation3 + $0x328] sm:$0xf] }
  0xaa   : > { %v382_v58 = vpop.f32.mrf.mxu0 }
  0xab   : > { %v388_v59 = vadd.f32 %v387_v57, %v381_v54  ;;  %v3877_v54 = vld [vmem:[#allocation3 + $0x324] sm:$0xf]  ;;  %v3894_v57 = vld [vmem:[#allocation3 + $0x3a4] sm:$0xf0]  ;;  %v3151_v58 = vor.u32 %v3876_v48, %v3148_v49  ;;  %v3554_v49 = vld [vmem:[#allocation3 + $0x630] sm:$0xf] }
  0xad   : > { %v389_v60 = vmul.f32 0.7978846, %v388_v59  ;;  %v3155_v59 = vor.u32 %v3893_v53, %v3154_v52  ;;  %v3556_v52 = vld [vmem:[#allocation3 + $0x6b0] sm:$0xf0]  ;;  %v3562_v53 = vld [vmem:[#allocation3 + $0x638] sm:$0xf] }
  0xaf   : > { %4109 = vtanh.f32 %v389_v60  ;;  %v3844_v60 = vld [vmem:[#allocation3 + $0x21c] sm:$0xf] }
  0xb5   : > { %v4110_v61 = vpop.eup %4109 }
  0xb6   : > { %v391_v63 = vadd.f32 1.0, %v4110_v61  ;;  %v3020_v61 = vld [vmem:[#allocation3 + $0x298] sm:$0xf0] }
  0xb7   : > { %v3023_v6 = vor.u32 %v3844_v60, %v3020_v61  ;;  %v3426_v61 = vld [vmem:[#allocation3 + $0x530] sm:$0xf] }
  0xb8   : > { %v392_v5 = vmul.f32 %v391_v63, %v384_v62  ;;  %v3159_v62 = vor.u32 %v3877_v54, %v3156_v55  ;;  %v3163_v63 = vor.u32 %v3894_v57, %v3162_v56  ;;  %v3992_v54 = vld [vmem:[#allocation3 + $0x6b4] sm:$0xf0]  ;;  %v3942_v57 = vld [vmem:[#allocation3 + $0x52c] sm:$0xf] }
  0xb9   : > { %v3563_v60 = vor.u32 %v3992_v54, %v3562_v53 }
  0xba   : > { %v4402_v9 = vpack.c.bf16 %v392_v5, %v392_v5  ;;  %v3862_v5 = vld [vmem:[#allocation3 + $0x2a4] sm:$0xf0] }
  0xbb   : > { %v3035_v12 = vor.u32 %v3862_v5, %v3034_v4  ;;  %v3910_v5 = vld [vmem:[#allocation3 + $0x42c] sm:$0xf] }
  0xbc   : > { %470 = vmatmul.bf16.vlgmr.msra.gmra.mxu1 %v4402_v9  ;;  %2092 = vmatmul.bf16.vlgmr.msra.gmra.mxu2 %v4402_v9 }
  0xbd   : > { %2105 = vmatmul.bf16.vlgmr.msra.gmra.mxu3 %v4402_v9  ;;  %2118 = vmatmul.bf16.vlgmr.msrb.gmra.mxu0 %v4402_v9 }
  0xbe   : > { %2175 = vmatpush.bf16.msra.mxu1 %v3663_v10  ;;  %2188 = vmatpush.bf16.msra.mxu2 %v3667_v11  ;;  %v2892_v10 = vld [vmem:[#allocation3 + $0x198] sm:$0xf0]  ;;  %v3031_v11 = vor.u32 %v3845_v2, %v3028_v3  ;;  %v3960_v2 = vld [vmem:[#allocation3 + $0x5b4] sm:$0xf0] }
  0xbf   : > { %2201 = vmatpush.bf16.msra.mxu3 %v3671_v14  ;;  %2214 = vmatpush.bf16.msrb.mxu0 %v3675_v15  ;;  %v3829_v14 = vld [vmem:[#allocation3 + $0x19c] sm:$0xf0]  ;;  %v3813_v15 = vld [vmem:[#allocation3 + $0x124] sm:$0xf]  ;;  %v2895_v20 = vor.u32 %v3812_v8, %v2892_v10  ;;  %v3435_v8 = vor.u32 %v3960_v2, %v3434_v1  ;;  %v3298_v10 = vld [vmem:[#allocation3 + $0x430] sm:$0xf] }
  0xc0   : > { %v2899_v21 = vor.u32 %v3829_v14, %v2898_v13  ;;  %v2903_v25 = vor.u32 %v3813_v15, %v2900_v16  ;;  %v3300_v13 = vld [vmem:[#allocation3 + $0x4b0] sm:$0xf0]  ;;  %v3306_v14 = vld [vmem:[#allocation3 + $0x438] sm:$0xf]  ;;  %v3692_v1 = vld [vmem:[#allocation3 + $0x7b8] sm:$0xf0] }
  0xc1   : > { %v3928_v15 = vld [vmem:[#allocation3 + $0x4b4] sm:$0xf0]  ;;  %v3698_v2 = vld [vmem:[#allocation3 + $0x740] sm:$0xf] }
  0xc2   : > { %2176 = vmatpush.bf16.msra.mxu1 %v3535_v22  ;;  %2189 = vmatpush.bf16.msra.mxu2 %v3539_v23  ;;  %v2764_v22 = vld [vmem:[#allocation3 + $0x98] sm:$0xf0]  ;;  %v2770_v23 = vld [vmem:[#allocation3 + $0x20] sm:$0xf] }
  0xc3   : > { %2202 = vmatpush.bf16.msra.mxu3 %v3543_v26  ;;  %2215 = vmatpush.bf16.msrb.mxu0 %v3547_v27  ;;  %v2907_v26 = vor.u32 %v3830_v18, %v2906_v17  ;;  %v3781_v27 = vld [vmem:[#allocation3 + $0x24] sm:$0xf]  ;;  %v2767_v36 = vor.u32 %v3780_v19, %v2764_v22  ;;  %v2771_v37 = vor.u32 %v3797_v24, %v2770_v23  ;;  %v3878_v18 = vld [vmem:[#allocation3 + $0x32c] sm:$0xf]  ;;  %v3170_v22 = vld [vmem:[#allocation3 + $0x330] sm:$0xf] }
  0xc4   : > { %v2775_v41 = vor.u32 %v3781_v27, %v2772_v28  ;;  %v3164_v19 = vld [vmem:[#allocation3 + $0x3a8] sm:$0xf0]  ;;  %v3895_v23 = vld [vmem:[#allocation3 + $0x3ac] sm:$0xf0]  ;;  %v3879_v24 = vld [vmem:[#allocation3 + $0x334] sm:$0xf] }
  0xc5   : > { %v3896_v27 = vld [vmem:[#allocation3 + $0x3b4] sm:$0xf0]  ;;  %v3167_v28 = vor.u32 %v3878_v18, %v3164_v19  ;;  %v3171_v29 = vor.u32 %v3895_v23, %v3170_v22  ;;  %v3570_v19 = vld [vmem:[#allocation3 + $0x640] sm:$0xf]  ;;  %v3572_v22 = vld [vmem:[#allocation3 + $0x6c0] sm:$0xf0] }
  0xc6   : > { %2177 = vmatpush.bf16.msra.mxu1 %v3407_v34  ;;  %2190 = vmatpush.bf16.msra.mxu2 %v3411_v35  ;;  %v4023_v34 = vld [vmem:[#allocation3 + $0x7ac] sm:$0xf0]  ;;  %v4007_v35 = vld [vmem:[#allocation3 + $0x734] sm:$0xf]  ;;  %v3578_v23 = vld [vmem:[#allocation3 + $0x648] sm:$0xf] }
  0xc7   : > { %2203 = vmatpush.bf16.msra.mxu3 %v3415_v38  ;;  %2216 = vmatpush.bf16.msrb.mxu0 %v3419_v39  ;;  %v3684_v38 = vld [vmem:[#allocation3 + $0x7b0] sm:$0xf0]  ;;  %v3690_v39 = vld [vmem:[#allocation3 + $0x738] sm:$0xf]  ;;  %v3683_v44 = vor.u32 %v4023_v34, %v3682_v33  ;;  %v3042_v34 = vld [vmem:[#allocation3 + $0x230] sm:$0xf] }
  0xc8   : > { %v3691_v48 = vor.u32 %v4024_v40, %v3690_v39  ;;  %v3864_v39 = vld [vmem:[#allocation3 + $0x2b4] sm:$0xf0]  ;;  %v3039_v40 = vor.u32 %v3846_v30, %v3036_v31  ;;  %v3442_v31 = vld [vmem:[#allocation3 + $0x540] sm:$0xf] }
  0xca   : > { %2178 = vmatpush.bf16.msra.mxu1 %v3279_v46  ;;  %2191 = vmatpush.bf16.msra.mxu2 %v3283_v47  ;;  %v3548_v46 = vld [vmem:[#allocation3 + $0x6a8] sm:$0xf0]  ;;  %v3687_v47 = vor.u32 %v4007_v35, %v3684_v38  ;;  %v3863_v35 = vld [vmem:[#allocation3 + $0x2ac] sm:$0xf0]  ;;  %v3050_v38 = vld [vmem:[#allocation3 + $0x238] sm:$0xf] }
  0xcb   : > { %2204 = vmatpush.bf16.msra.mxu3 %v3287_v50  ;;  %2217 = vmatpush.bf16.msrb.mxu0 %v3291_v51  ;;  %v3991_v50 = vld [vmem:[#allocation3 + $0x6ac] sm:$0xf0]  ;;  %v3975_v51 = vld [vmem:[#allocation3 + $0x634] sm:$0xf]  ;;  %v3551_v55 = vor.u32 %v3974_v45, %v3548_v46  ;;  %v3051_v45 = vor.u32 %v3864_v39, %v3050_v38  ;;  %v3912_v39 = vld [vmem:[#allocation3 + $0x43c] sm:$0xf] }
  0xcc   : > { %2131 = vmatmul.bf16.vlgmr.msrb.gmra.mxu1 %v4402_v9  ;;  %2144 = vmatmul.bf16.vlgmr.msrb.gmra.mxu2 %v4402_v9  ;;  %v3555_v56 = vor.u32 %v3991_v50, %v3554_v49  ;;  %v2914_v46 = vld [vmem:[#allocation3 + $0x130] sm:$0xf]  ;;  %v2916_v49 = vld [vmem:[#allocation3 + $0x1b0] sm:$0xf0]  ;;  %v2922_v50 = vld [vmem:[#allocation3 + $0x138] sm:$0xf] }
  0xcd   : > { %2157 = vmatmul.bf16.vlgmr.msrb.gmra.mxu3 %v4402_v9  ;;  %2170 = vmatmul.bf16.vlgmr.msra.gmra.mxu0 %v4402_v9 }
  0xce   : > { %2179 = vmatpush.bf16.msra.mxu1 %v3151_v58  ;;  %2192 = vmatpush.bf16.msra.mxu2 %v3155_v59  ;;  %v3420_v58 = vld [vmem:[#allocation3 + $0x5a8] sm:$0xf0]  ;;  %v3559_v59 = vor.u32 %v3975_v51, %v3556_v52  ;;  %v3832_v51 = vld [vmem:[#allocation3 + $0x1b4] sm:$0xf0] }
  0xcf   : > { %2205 = vmatpush.bf16.msra.mxu3 %v3159_v62  ;;  %2218 = vmatpush.bf16.msrb.mxu0 %v3163_v63  ;;  %v3959_v62 = vld [vmem:[#allocation3 + $0x5ac] sm:$0xf0]  ;;  %v3943_v63 = vld [vmem:[#allocation3 + $0x534] sm:$0xf]  ;;  %v3423_v3 = vor.u32 %v3942_v57, %v3420_v58  ;;  %v3782_v52 = vld [vmem:[#allocation3 + $0x2c] sm:$0xf] }
  0xd0   : > { %v3427_v4 = vor.u32 %v3959_v62, %v3426_v61  ;;  %v3799_v57 = vld [vmem:[#allocation3 + $0xac] sm:$0xf0]  ;;  %v2788_v61 = vld [vmem:[#allocation3 + $0xb0] sm:$0xf0]  ;;  %v2794_v62 = vld [vmem:[#allocation3 + $0x38] sm:$0xf] }
  0xd2   : > { %2180 = vmatpush.bf16.msra.mxu1 %v3023_v6  ;;  %2193 = vmatpush.bf16.msra.mxu2 %v3027_v7  ;;  %v3292_v6 = vld [vmem:[#allocation3 + $0x4a8] sm:$0xf0]  ;;  %v3431_v7 = vor.u32 %v3943_v63, %v3428_v0  ;;  %v3800_v63 = vld [vmem:[#allocation3 + $0xb4] sm:$0xf0]  ;;  %v4008_v0 = vld [vmem:[#allocation3 + $0x73c] sm:$0xf] }
  0xd3   : > { %2206 = vmatpush.bf16.msra.mxu3 %v3031_v11  ;;  %2219 = vmatpush.bf16.msrb.mxu0 %v3035_v12  ;;  %v3927_v11 = vld [vmem:[#allocation3 + $0x4ac] sm:$0xf0]  ;;  %v3911_v12 = vld [vmem:[#allocation3 + $0x434] sm:$0xf]  ;;  %v3295_v16 = vor.u32 %v3910_v5, %v3292_v6 }
  0xd4   : > { %v3299_v17 = vor.u32 %v3927_v11, %v3298_v10  ;;  %v4026_v10 = vld [vmem:[#allocation3 + $0x7c4] sm:$0xf0] }
  0xd6   : > { %2181 = vmatpush.bf16.msra.mxu1 %v2895_v20  ;;  %2194 = vmatpush.bf16.msra.mxu2 %v2899_v21  ;;  %v3303_v20 = vor.u32 %v3911_v12, %v3300_v13  ;;  %v3307_v21 = vor.u32 %v3928_v15, %v3306_v14  ;;  %v2795_v12 = vor.u32 %v3800_v63, %v2794_v62  ;;  %v3976_v15 = vld [vmem:[#allocation3 + $0x63c] sm:$0xf] }
  0xd7   : > { %2207 = vmatpush.bf16.msra.mxu3 %v2903_v25  ;;  %2220 = vmatpush.bf16.msrb.mxu0 %v2907_v26  ;;  %v3172_v25 = vld [vmem:[#allocation3 + $0x3b0] sm:$0xf0]  ;;  %v3178_v26 = vld [vmem:[#allocation3 + $0x338] sm:$0xf]  ;;  %v3695_v13 = vor.u32 %v4008_v0, %v3692_v1  ;;  %v3848_v63 = vld [vmem:[#allocation3 + $0x23c] sm:$0xf] }
  0xd8   : > { %v3175_v32 = vor.u32 %v3879_v24, %v3172_v25  ;;  %v3179_v33 = vor.u32 %v3896_v27, %v3178_v26  ;;  %v3994_v24 = vld [vmem:[#allocation3 + $0x6c4] sm:$0xf0]  ;;  %v3944_v27 = vld [vmem:[#allocation3 + $0x53c] sm:$0xf] }
  0xd9   : > { %v3579_v30 = vor.u32 %v3994_v24, %v3578_v23  ;;  %v3052_v0 = vld [vmem:[#allocation3 + $0x2b8] sm:$0xf0] }
  0xda   : > { %2182 = vmatpush.bf16.msra.mxu1 %v2767_v36  ;;  %2195 = vmatpush.bf16.msra.mxu2 %v2771_v37  ;;  %v3847_v36 = vld [vmem:[#allocation3 + $0x234] sm:$0xf] }
  0xdb   : > { %2208 = vmatpush.bf16.msra.mxu3 %v2775_v41  ;;  %2221 = vmatpush.bf16.msrb.mxu0 %v2779_v42  ;;  %v3044_v37 = vld [vmem:[#allocation3 + $0x2b0] sm:$0xf0]  ;;  %v3043_v41 = vor.u32 %v3863_v35, %v3042_v34  ;;  %v3814_v42 = vld [vmem:[#allocation3 + $0x12c] sm:$0xf]  ;;  %v3444_v34 = vld [vmem:[#allocation3 + $0x5c0] sm:$0xf0] }
  0xdc   : > { %v3450_v35 = vld [vmem:[#allocation3 + $0x548] sm:$0xf] }
  0xdd   : > { %2183 = vmatmul.bf16.vlgmr.msra.gmra.mxu1 %v4402_v9  ;;  %2196 = vmatmul.bf16.vlgmr.msra.gmra.mxu2 %v4402_v9 }
  0xde   : > { %2227 = vmatpush.bf16.msrb.mxu1 %v3679_v43  ;;  %2240 = vmatpush.bf16.msrb.mxu2 %v3683_v44  ;;  %v2908_v43 = vld [vmem:[#allocation3 + $0x1a8] sm:$0xf0]  ;;  %v3047_v44 = vor.u32 %v3847_v36, %v3044_v37  ;;  %v3962_v36 = vld [vmem:[#allocation3 + $0x5c4] sm:$0xf0] }
  0xdf   : > { %2253 = vmatpush.bf16.msrb.mxu3 %v3687_v47  ;;  %2266 = vmatpush.bf16.msra.mxu0 %v3691_v48  ;;  %v3831_v47 = vld [vmem:[#allocation3 + $0x1ac] sm:$0xf0]  ;;  %v3815_v48 = vld [vmem:[#allocation3 + $0x134] sm:$0xf]  ;;  %v2911_v53 = vor.u32 %v3814_v42, %v2908_v43  ;;  %v3451_v42 = vor.u32 %v3962_v36, %v3450_v35  ;;  %v3314_v43 = vld [vmem:[#allocation3 + $0x440] sm:$0xf] }
  0xe0   : > { %2209 = vmatmul.bf16.vlgmr.msra.gmra.mxu3 %v4402_v9  ;;  %2222 = vmatmul.bf16.vlgmr.msrb.gmra.mxu0 %v4402_v9  ;;  %v2915_v54 = vor.u32 %v3831_v47, %v2914_v46  ;;  %v2919_v58 = vor.u32 %v3815_v48, %v2916_v49  ;;  %v3316_v46 = vld [vmem:[#allocation3 + $0x4c0] sm:$0xf0]  ;;  %v3322_v47 = vld [vmem:[#allocation3 + $0x448] sm:$0xf]  ;;  %v3708_v35 = vld [vmem:[#allocation3 + $0x7c8] sm:$0xf0] }
  0xe1   : > { %v3930_v48 = vld [vmem:[#allocation3 + $0x4c4] sm:$0xf0]  ;;  %v3714_v36 = vld [vmem:[#allocation3 + $0x750] sm:$0xf] }
  0xe2   : > { %2228 = vmatpush.bf16.msrb.mxu1 %v3551_v55  ;;  %2241 = vmatpush.bf16.msrb.mxu2 %v3555_v56  ;;  %v2780_v55 = vld [vmem:[#allocation3 + $0xa8] sm:$0xf0]  ;;  %v2786_v56 = vld [vmem:[#allocation3 + $0x30] sm:$0xf] }
  0xe3   : > { %2254 = vmatpush.bf16.msrb.mxu3 %v3559_v59  ;;  %2267 = vmatpush.bf16.msra.mxu0 %v3563_v60  ;;  %v2923_v59 = vor.u32 %v3832_v51, %v2922_v50  ;;  %v3783_v60 = vld [vmem:[#allocation3 + $0x34] sm:$0xf]  ;;  %v2783_v5 = vor.u32 %v3782_v52, %v2780_v55  ;;  %v2787_v6 = vor.u32 %v3799_v57, %v2786_v56  ;;  %v3880_v51 = vld [vmem:[#allocation3 + $0x33c] sm:$0xf]  ;;  %v3186_v55 = vld [vmem:[#allocation3 + $0x340] sm:$0xf] }
  0xe4   : > { %v2791_v11 = vor.u32 %v3783_v60, %v2788_v61  ;;  %v3180_v52 = vld [vmem:[#allocation3 + $0x3b8] sm:$0xf0]  ;;  %v3897_v56 = vld [vmem:[#allocation3 + $0x3bc] sm:$0xf0]  ;;  %v3881_v57 = vld [vmem:[#allocation3 + $0x344] sm:$0xf] }
  0xe5   : > { %v3898_v60 = vld [vmem:[#allocation3 + $0x3c4] sm:$0xf0]  ;;  %v3183_v61 = vor.u32 %v3880_v51, %v3180_v52  ;;  %v3187_v62 = vor.u32 %v3897_v56, %v3186_v55  ;;  %v3586_v52 = vld [vmem:[#allocation3 + $0x650] sm:$0xf]  ;;  %v3588_v55 = vld [vmem:[#allocation3 + $0x6d0] sm:$0xf0] }
  0xe6   : > { %2229 = vmatpush.bf16.msrb.mxu1 %v3423_v3  ;;  %2242 = vmatpush.bf16.msrb.mxu2 %v3427_v4  ;;  %v4025_v3 = vld [vmem:[#allocation3 + $0x7bc] sm:$0xf0]  ;;  %v4009_v4 = vld [vmem:[#allocation3 + $0x744] sm:$0xf]  ;;  %v3594_v56 = vld [vmem:[#allocation3 + $0x658] sm:$0xf] }
  0xe7   : > { %2255 = vmatpush.bf16.msrb.mxu3 %v3431_v7  ;;  %2268 = vmatpush.bf16.msra.mxu0 %v3435_v8  ;;  %v3700_v7 = vld [vmem:[#allocation3 + $0x7c0] sm:$0xf0]  ;;  %v3706_v8 = vld [vmem:[#allocation3 + $0x748] sm:$0xf]  ;;  %v3699_v14 = vor.u32 %v4025_v3, %v3698_v2  ;;  %v3058_v3 = vld [vmem:[#allocation3 + $0x240] sm:$0xf] }
  0xe8   : > { %v3707_v18 = vor.u32 %v4026_v10, %v3706_v8  ;;  %v3866_v8 = vld [vmem:[#allocation3 + $0x2c4] sm:$0xf0]  ;;  %v3055_v10 = vor.u32 %v3848_v63, %v3052_v0  ;;  %v3458_v0 = vld [vmem:[#allocation3 + $0x550] sm:$0xf] }
  0xea   : > { %2230 = vmatpush.bf16.msrb.mxu1 %v3295_v16  ;;  %2243 = vmatpush.bf16.msrb.mxu2 %v3299_v17  ;;  %v3564_v16 = vld [vmem:[#allocation3 + $0x6b8] sm:$0xf0]  ;;  %v3703_v17 = vor.u32 %v4009_v4, %v3700_v7  ;;  %v3865_v4 = vld [vmem:[#allocation3 + $0x2bc] sm:$0xf0]  ;;  %v3066_v7 = vld [vmem:[#allocation3 + $0x248] sm:$0xf] }
  0xeb   : > { %2256 = vmatpush.bf16.msrb.mxu3 %v3303_v20  ;;  %2269 = vmatpush.bf16.msra.mxu0 %v3307_v21  ;;  %v3993_v20 = vld [vmem:[#allocation3 + $0x6bc] sm:$0xf0]  ;;  %v3977_v21 = vld [vmem:[#allocation3 + $0x644] sm:$0xf]  ;;  %v3567_v25 = vor.u32 %v3976_v15, %v3564_v16  ;;  %v3067_v15 = vor.u32 %v3866_v8, %v3066_v7  ;;  %v3914_v8 = vld [vmem:[#allocation3 + $0x44c] sm:$0xf] }
  0xec   : > { %v3571_v26 = vor.u32 %v3993_v20, %v3570_v19  ;;  %v2930_v16 = vld [vmem:[#allocation3 + $0x140] sm:$0xf]  ;;  %v2932_v19 = vld [vmem:[#allocation3 + $0x1c0] sm:$0xf0]  ;;  %v2938_v20 = vld [vmem:[#allocation3 + $0x148] sm:$0xf] }
  0xee   : > { %2231 = vmatpush.bf16.msrb.mxu1 %v3167_v28  ;;  %2244 = vmatpush.bf16.msrb.mxu2 %v3171_v29  ;;  %v3436_v28 = vld [vmem:[#allocation3 + $0x5b8] sm:$0xf0]  ;;  %v3575_v29 = vor.u32 %v3977_v21, %v3572_v22  ;;  %v3834_v21 = vld [vmem:[#allocation3 + $0x1c4] sm:$0xf0] }
  0xef   : > { %2257 = vmatpush.bf16.msrb.mxu3 %v3175_v32  ;;  %2270 = vmatpush.bf16.msra.mxu0 %v3179_v33  ;;  %v3961_v32 = vld [vmem:[#allocation3 + $0x5bc] sm:$0xf0]  ;;  %v3945_v33 = vld [vmem:[#allocation3 + $0x544] sm:$0xf]  ;;  %v3439_v37 = vor.u32 %v3944_v27, %v3436_v28  ;;  %v3784_v22 = vld [vmem:[#allocation3 + $0x3c] sm:$0xf] }
  0xf0   : > { %v3443_v38 = vor.u32 %v3961_v32, %v3442_v31  ;;  %v3801_v27 = vld [vmem:[#allocation3 + $0xbc] sm:$0xf0]  ;;  %v2804_v31 = vld [vmem:[#allocation3 + $0xc0] sm:$0xf0]  ;;  %v2810_v32 = vld [vmem:[#allocation3 + $0x48] sm:$0xf] }
  0xf2   : > { %2232 = vmatpush.bf16.msrb.mxu1 %v3039_v40  ;;  %2245 = vmatpush.bf16.msrb.mxu2 %v3043_v41  ;;  %v3308_v40 = vld [vmem:[#allocation3 + $0x4b8] sm:$0xf0]  ;;  %v3447_v41 = vor.u32 %v3945_v33, %v3444_v34  ;;  %v3802_v33 = vld [vmem:[#allocation3 + $0xc4] sm:$0xf0]  ;;  %v4010_v34 = vld [vmem:[#allocation3 + $0x74c] sm:$0xf] }
  0xf3   : > { %2258 = vmatpush.bf16.msrb.mxu3 %v3047_v44  ;;  %2271 = vmatpush.bf16.msra.mxu0 %v3051_v45  ;;  %v3929_v44 = vld [vmem:[#allocation3 + $0x4bc] sm:$0xf0]  ;;  %v3913_v45 = vld [vmem:[#allocation3 + $0x444] sm:$0xf]  ;;  %v3311_v49 = vor.u32 %v3912_v39, %v3308_v40 }
  0xf4   : > { %v3315_v50 = vor.u32 %v3929_v44, %v3314_v43  ;;  %v4028_v43 = vld [vmem:[#allocation3 + $0x7d4] sm:$0xf0] }
  0xf6   : > { %2233 = vmatpush.bf16.msrb.mxu1 %v2911_v53  ;;  %2246 = vmatpush.bf16.msrb.mxu2 %v2915_v54  ;;  %v3319_v53 = vor.u32 %v3913_v45, %v3316_v46  ;;  %v3323_v54 = vor.u32 %v3930_v48, %v3322_v47  ;;  %v2811_v45 = vor.u32 %v3802_v33, %v2810_v32  ;;  %v3978_v48 = vld [vmem:[#allocation3 + $0x64c] sm:$0xf] }
  0xf7   : > { %2259 = vmatpush.bf16.msrb.mxu3 %v2919_v58  ;;  %2272 = vmatpush.bf16.msra.mxu0 %v2923_v59  ;;  %v3188_v58 = vld [vmem:[#allocation3 + $0x3c0] sm:$0xf0]  ;;  %v3194_v59 = vld [vmem:[#allocation3 + $0x348] sm:$0xf]  ;;  %v3711_v46 = vor.u32 %v4010_v34, %v3708_v35  ;;  %v3850_v33 = vld [vmem:[#allocation3 + $0x24c] sm:$0xf] }
  0xf8   : > { %v3191_v1 = vor.u32 %v3881_v57, %v3188_v58  ;;  %v3195_v2 = vor.u32 %v3898_v60, %v3194_v59  ;;  %v3996_v57 = vld [vmem:[#allocation3 + $0x6d4] sm:$0xf0]  ;;  %v3946_v60 = vld [vmem:[#allocation3 + $0x54c] sm:$0xf] }
  0xf9   : > { %v3595_v63 = vor.u32 %v3996_v57, %v3594_v56  ;;  %v3068_v34 = vld [vmem:[#allocation3 + $0x2c8] sm:$0xf0] }
  0xfa   : > { %2234 = vmatpush.bf16.msrb.mxu1 %v2783_v5  ;;  %2247 = vmatpush.bf16.msrb.mxu2 %v2787_v6  ;;  %v3849_v5 = vld [vmem:[#allocation3 + $0x244] sm:$0xf] }
  0xfb   : > { %2260 = vmatpush.bf16.msrb.mxu3 %v2791_v11  ;;  %2273 = vmatpush.bf16.msra.mxu0 %v2795_v12  ;;  %v3060_v6 = vld [vmem:[#allocation3 + $0x2c0] sm:$0xf0]  ;;  %v3059_v11 = vor.u32 %v3865_v4, %v3058_v3  ;;  %v3816_v12 = vld [vmem:[#allocation3 + $0x13c] sm:$0xf]  ;;  %v3460_v3 = vld [vmem:[#allocation3 + $0x5d0] sm:$0xf0] }
  0xfc   : > { %v3466_v4 = vld [vmem:[#allocation3 + $0x558] sm:$0xf] }
  0xfd   : > { %2235 = vmatmul.bf16.vlgmr.msrb.gmra.mxu1 %v4402_v9  ;;  %2248 = vmatmul.bf16.vlgmr.msrb.gmra.mxu2 %v4402_v9 }
  0xfe   : > { %2279 = vmatpush.bf16.msra.mxu1 %v3695_v13  ;;  %2292 = vmatpush.bf16.msra.mxu2 %v3699_v14  ;;  %v2924_v13 = vld [vmem:[#allocation3 + $0x1b8] sm:$0xf0]  ;;  %v3063_v14 = vor.u32 %v3849_v5, %v3060_v6  ;;  %v3964_v5 = vld [vmem:[#allocation3 + $0x5d4] sm:$0xf0] }
  0xff   : > { %2305 = vmatpush.bf16.msra.mxu3 %v3703_v17  ;;  %2318 = vmatpush.bf16.msrb.mxu0 %v3707_v18  ;;  %v3833_v17 = vld [vmem:[#allocation3 + $0x1bc] sm:$0xf0]  ;;  %v3817_v18 = vld [vmem:[#allocation3 + $0x144] sm:$0xf]  ;;  %v2927_v23 = vor.u32 %v3816_v12, %v2924_v13  ;;  %v3467_v12 = vor.u32 %v3964_v5, %v3466_v4  ;;  %v3330_v13 = vld [vmem:[#allocation3 + $0x450] sm:$0xf] }
 0x100   : > { %2261 = vmatmul.bf16.vlgmr.msrb.gmra.mxu3 %v4402_v9  ;;  %2274 = vmatmul.bf16.vlgmr.msra.gmra.mxu0 %v4402_v9  ;;  %v2931_v24 = vor.u32 %v3833_v17, %v2930_v16  ;;  %v2935_v28 = vor.u32 %v3817_v18, %v2932_v19  ;;  %v3332_v16 = vld [vmem:[#allocation3 + $0x4d0] sm:$0xf0]  ;;  %v3338_v17 = vld [vmem:[#allocation3 + $0x458] sm:$0xf]  ;;  %v3724_v4 = vld [vmem:[#allocation3 + $0x7d8] sm:$0xf0] }
 0x101   : > { %v3932_v18 = vld [vmem:[#allocation3 + $0x4d4] sm:$0xf0]  ;;  %v3730_v5 = vld [vmem:[#allocation3 + $0x760] sm:$0xf] }
 0x102   : > { %2280 = vmatpush.bf16.msra.mxu1 %v3567_v25  ;;  %2293 = vmatpush.bf16.msra.mxu2 %v3571_v26  ;;  %v2796_v25 = vld [vmem:[#allocation3 + $0xb8] sm:$0xf0]  ;;  %v2802_v26 = vld [vmem:[#allocation3 + $0x40] sm:$0xf] }
 0x103   : > { %2306 = vmatpush.bf16.msra.mxu3 %v3575_v29  ;;  %2319 = vmatpush.bf16.msrb.mxu0 %v3579_v30  ;;  %v2939_v29 = vor.u32 %v3834_v21, %v2938_v20  ;;  %v3785_v30 = vld [vmem:[#allocation3 + $0x44] sm:$0xf]  ;;  %v2799_v39 = vor.u32 %v3784_v22, %v2796_v25  ;;  %v2803_v40 = vor.u32 %v3801_v27, %v2802_v26  ;;  %v3882_v21 = vld [vmem:[#allocation3 + $0x34c] sm:$0xf]  ;;  %v3202_v25 = vld [vmem:[#allocation3 + $0x350] sm:$0xf] }
 0x104   : > { %v2807_v44 = vor.u32 %v3785_v30, %v2804_v31  ;;  %v3196_v22 = vld [vmem:[#allocation3 + $0x3c8] sm:$0xf0]  ;;  %v3899_v26 = vld [vmem:[#allocation3 + $0x3cc] sm:$0xf0]  ;;  %v3883_v27 = vld [vmem:[#allocation3 + $0x354] sm:$0xf] }
 0x105   : > { %v3900_v30 = vld [vmem:[#allocation3 + $0x3d4] sm:$0xf0]  ;;  %v3199_v31 = vor.u32 %v3882_v21, %v3196_v22  ;;  %v3203_v32 = vor.u32 %v3899_v26, %v3202_v25  ;;  %v3604_v25 = vld [vmem:[#allocation3 + $0x6e0] sm:$0xf0]  ;;  %v3610_v26 = vld [vmem:[#allocation3 + $0x668] sm:$0xf] }
 0x106   : > { %2281 = vmatpush.bf16.msra.mxu1 %v3439_v37  ;;  %2294 = vmatpush.bf16.msra.mxu2 %v3443_v38  ;;  %v4027_v37 = vld [vmem:[#allocation3 + $0x7cc] sm:$0xf0]  ;;  %v4011_v38 = vld [vmem:[#allocation3 + $0x754] sm:$0xf] }
 0x107   : > { %2307 = vmatpush.bf16.msra.mxu3 %v3447_v41  ;;  %2320 = vmatpush.bf16.msrb.mxu0 %v3451_v42  ;;  %v3716_v41 = vld [vmem:[#allocation3 + $0x7d0] sm:$0xf0]  ;;  %v3722_v42 = vld [vmem:[#allocation3 + $0x758] sm:$0xf]  ;;  %v3715_v47 = vor.u32 %v4027_v37, %v3714_v36  ;;  %v3074_v37 = vld [vmem:[#allocation3 + $0x250] sm:$0xf] }
 0x108   : > { %v3723_v51 = vor.u32 %v4028_v43, %v3722_v42  ;;  %v3868_v42 = vld [vmem:[#allocation3 + $0x2d4] sm:$0xf0]  ;;  %v3071_v43 = vor.u32 %v3850_v33, %v3068_v34  ;;  %v3474_v33 = vld [vmem:[#allocation3 + $0x560] sm:$0xf] }
 0x109   : > { %v4108_v34 = vld [vmem:[%s4587_s4] ss:$0 sm:$0xff] }
 0x10a   : > { %2282 = vmatpush.bf16.msra.mxu1 %v3311_v49  ;;  %2295 = vmatpush.bf16.msra.mxu2 %v3315_v50  ;;  %v3580_v49 = vld [vmem:[#allocation3 + $0x6c8] sm:$0xf0]  ;;  %v3719_v50 = vor.u32 %v4011_v38, %v3716_v41  ;;  %v3867_v38 = vld [vmem:[#allocation3 + $0x2cc] sm:$0xf0]  ;;  %v3082_v41 = vld [vmem:[#allocation3 + $0x258] sm:$0xf] }
 0x10b   : > { %2308 = vmatpush.bf16.msra.mxu3 %v3319_v53  ;;  %2321 = vmatpush.bf16.msrb.mxu0 %v3323_v54  ;;  %v3995_v53 = vld [vmem:[#allocation3 + $0x6cc] sm:$0xf0]  ;;  %v3979_v54 = vld [vmem:[#allocation3 + $0x654] sm:$0xf]  ;;  %v3583_v58 = vor.u32 %v3978_v48, %v3580_v49  ;;  %v3083_v48 = vor.u32 %v3868_v42, %v3082_v41  ;;  %v3482_v41 = vld [vmem:[#allocation3 + $0x568] sm:$0xf] }
 0x10c   : > { %v3587_v59 = vor.u32 %v3995_v53, %v3586_v52  ;;  %v2946_v49 = vld [vmem:[#allocation3 + $0x150] sm:$0xf]  ;;  %v2948_v52 = vld [vmem:[#allocation3 + $0x1d0] sm:$0xf0]  ;;  %v2954_v53 = vld [vmem:[#allocation3 + $0x158] sm:$0xf] }
 0x10d   : > { %v3966_v42 = vld [vmem:[#allocation3 + $0x5e4] sm:$0xf0] }
 0x10e   : > { %2283 = vmatpush.bf16.msra.mxu1 %v3183_v61  ;;  %2296 = vmatpush.bf16.msra.mxu2 %v3187_v62  ;;  %v3452_v61 = vld [vmem:[#allocation3 + $0x5c8] sm:$0xf0]  ;;  %v3591_v62 = vor.u32 %v3979_v54, %v3588_v55  ;;  %v3836_v54 = vld [vmem:[#allocation3 + $0x1d4] sm:$0xf0] }
 0x10f   : > { %2309 = vmatpush.bf16.msra.mxu3 %v3191_v1  ;;  %2322 = vmatpush.bf16.msrb.mxu0 %v3195_v2  ;;  %v3963_v1 = vld [vmem:[#allocation3 + $0x5cc] sm:$0xf0]  ;;  %v3947_v2 = vld [vmem:[#allocation3 + $0x554] sm:$0xf]  ;;  %v3455_v6 = vor.u32 %v3946_v60, %v3452_v61  ;;  %v3786_v55 = vld [vmem:[#allocation3 + $0x4c] sm:$0xf] }
 0x110   : > { %v3459_v7 = vor.u32 %v3963_v1, %v3458_v0  ;;  %v3803_v60 = vld [vmem:[#allocation3 + $0xcc] sm:$0xf0]  ;;  %v2820_v0 = vld [vmem:[#allocation3 + $0xd0] sm:$0xf0]  ;;  %v2826_v1 = vld [vmem:[#allocation3 + $0x58] sm:$0xf] }
 0x112   : > { %2284 = vmatpush.bf16.msra.mxu1 %v3055_v10  ;;  %2297 = vmatpush.bf16.msra.mxu2 %v3059_v11  ;;  %v3324_v10 = vld [vmem:[#allocation3 + $0x4c8] sm:$0xf0]  ;;  %v3463_v11 = vor.u32 %v3947_v2, %v3460_v3  ;;  %v3804_v2 = vld [vmem:[#allocation3 + $0xd4] sm:$0xf0]  ;;  %v4012_v3 = vld [vmem:[#allocation3 + $0x75c] sm:$0xf] }
 0x113   : > { %2310 = vmatpush.bf16.msra.mxu3 %v3063_v14  ;;  %2323 = vmatpush.bf16.msrb.mxu0 %v3067_v15  ;;  %v3931_v14 = vld [vmem:[#allocation3 + $0x4cc] sm:$0xf0]  ;;  %v3915_v15 = vld [vmem:[#allocation3 + $0x454] sm:$0xf]  ;;  %v3327_v19 = vor.u32 %v3914_v8, %v3324_v10 }
 0x114   : > { %v3331_v20 = vor.u32 %v3931_v14, %v3330_v13  ;;  %v4030_v13 = vld [vmem:[#allocation3 + $0x7e4] sm:$0xf0] }
 0x116   : > { %2285 = vmatpush.bf16.msra.mxu1 %v2927_v23  ;;  %2298 = vmatpush.bf16.msra.mxu2 %v2931_v24  ;;  %v3335_v23 = vor.u32 %v3915_v15, %v3332_v16  ;;  %v3339_v24 = vor.u32 %v3932_v18, %v3338_v17  ;;  %v2827_v15 = vor.u32 %v3804_v2, %v2826_v1  ;;  %v3980_v18 = vld [vmem:[#allocation3 + $0x65c] sm:$0xf] }
 0x117   : > { %2311 = vmatpush.bf16.msra.mxu3 %v2935_v28  ;;  %2324 = vmatpush.bf16.msrb.mxu0 %v2939_v29  ;;  %v3204_v28 = vld [vmem:[#allocation3 + $0x3d0] sm:$0xf0]  ;;  %v3210_v29 = vld [vmem:[#allocation3 + $0x358] sm:$0xf]  ;;  %v3727_v16 = vor.u32 %v4012_v3, %v3724_v4  ;;  %v3218_v4 = vld [vmem:[#allocation3 + $0x360] sm:$0xf] }
 0x118   : > { %v3207_v35 = vor.u32 %v3883_v27, %v3204_v28  ;;  %v3211_v36 = vor.u32 %v3900_v30, %v3210_v29  ;;  %v3998_v27 = vld [vmem:[#allocation3 + $0x6e4] sm:$0xf0]  ;;  %v4430_v28 = vld [vmem:[%s4589_s6] sm:$0xff]  ;;  %v3948_v29 = vld [vmem:[#allocation3 + $0x55c] sm:$0xf] }
 0x11a   : > { %2286 = vmatpush.bf16.msra.mxu1 %v2799_v39  ;;  %2299 = vmatpush.bf16.msra.mxu2 %v2803_v40  ;;  %v3851_v39 = vld [vmem:[#allocation3 + $0x254] sm:$0xf] }
 0x11b   : > { %2312 = vmatpush.bf16.msra.mxu3 %v2807_v44  ;;  %2325 = vmatpush.bf16.msrb.mxu0 %v2811_v45  ;;  %v3076_v40 = vld [vmem:[#allocation3 + $0x2d0] sm:$0xf0]  ;;  %v3075_v44 = vor.u32 %v3867_v38, %v3074_v37  ;;  %v3818_v45 = vld [vmem:[#allocation3 + $0x14c] sm:$0xf]  ;;  %v3965_v37 = vld [vmem:[#allocation3 + $0x5dc] sm:$0xf0] }
 0x11c   : > { %v3949_v38 = vld [vmem:[#allocation3 + $0x564] sm:$0xf] }
 0x11d   : > { %2287 = vmatmul.bf16.vlgmr.msra.gmra.mxu1 %v4402_v9  ;;  %2300 = vmatmul.bf16.vlgmr.msra.gmra.mxu2 %v4402_v9 }
 0x11e   : > { %2331 = vmatpush.bf16.msrb.mxu1 %v3711_v46  ;;  %2344 = vmatpush.bf16.msrb.mxu2 %v3715_v47  ;;  %v2940_v46 = vld [vmem:[#allocation3 + $0x1c8] sm:$0xf0]  ;;  %v3079_v47 = vor.u32 %v3851_v39, %v3076_v40  ;;  %v742_v39 = vperm.slane %v4430_v28, 2  ;;  %v3476_v40 = vld [vmem:[#allocation3 + $0x5e0] sm:$0xf0] }
 0x11f   : > { %2357 = vmatpush.bf16.msrb.mxu3 %v3719_v50  ;;  %2370 = vmatpush.bf16.msra.mxu0 %v3723_v51  ;;  %v3835_v50 = vld [vmem:[#allocation3 + $0x1cc] sm:$0xf0]  ;;  %v3819_v51 = vld [vmem:[#allocation3 + $0x154] sm:$0xf]  ;;  %v2943_v56 = vor.u32 %v3818_v45, %v2940_v46  ;;  %v3475_v45 = vor.u32 %v3965_v37, %v3474_v33  ;;  %v2962_v33 = vld [vmem:[#allocation3 + $0x160] sm:$0xf] }
 0x120   : > { %2313 = vmatmul.bf16.vlgmr.msra.gmra.mxu3 %v4402_v9  ;;  %2326 = vmatmul.bf16.vlgmr.msrb.gmra.mxu0 %v4402_v9  ;;  %v2947_v57 = vor.u32 %v3835_v50, %v2946_v49  ;;  %v2951_v61 = vor.u32 %v3819_v51, %v2948_v52  ;;  %v3340_v49 = vld [vmem:[#allocation3 + $0x4d8] sm:$0xf0]  ;;  %v3346_v50 = vld [vmem:[#allocation3 + $0x460] sm:$0xf]  ;;  %v3479_v51 = vor.u32 %v3949_v38, %v3476_v40  ;;  %v746_v40 = vperm.slane %v4430_v28, 6 }
 0x121   : > { %v3483_v52 = vor.u32 %v3966_v42, %v3482_v41  ;;  %v3837_v38 = vld [vmem:[#allocation3 + $0x1dc] sm:$0xf0]  ;;  %v2964_v42 = vld [vmem:[#allocation3 + $0x1e0] sm:$0xf0] }
 0x122   : > { %2332 = vmatpush.bf16.msrb.mxu1 %v3583_v58  ;;  %2345 = vmatpush.bf16.msrb.mxu2 %v3587_v59  ;;  %v2812_v58 = vld [vmem:[#allocation3 + $0xc8] sm:$0xf0]  ;;  %v2818_v59 = vld [vmem:[#allocation3 + $0x50] sm:$0xf] }
 0x123   : > { %2358 = vmatpush.bf16.msrb.mxu3 %v3591_v62  ;;  %2371 = vmatpush.bf16.msra.mxu0 %v3595_v63  ;;  %v2955_v62 = vor.u32 %v3836_v54, %v2954_v53  ;;  %v3787_v63 = vld [vmem:[#allocation3 + $0x54] sm:$0xf]  ;;  %v2815_v8 = vor.u32 %v3786_v55, %v2812_v58  ;;  %v2819_v10 = vor.u32 %v3803_v60, %v2818_v59  ;;  %v3933_v54 = vld [vmem:[#allocation3 + $0x4dc] sm:$0xf0]  ;;  %v3917_v55 = vld [vmem:[#allocation3 + $0x464] sm:$0xf] }
 0x124   : > { %v2823_v14 = vor.u32 %v3787_v63, %v2820_v0  ;;  %v3934_v58 = vld [vmem:[#allocation3 + $0x4e4] sm:$0xf0]  ;;  %v740_v59 = vperm.slane %v4430_v28, 0  ;;  %v741_v60 = vperm.slane %v4430_v28, 1  ;;  %v3884_v63 = vld [vmem:[#allocation3 + $0x35c] sm:$0xf] }
 0x125   : > { %v3212_v0 = vld [vmem:[#allocation3 + $0x3d8] sm:$0xf0] }
 0x126   : > { %2333 = vmatpush.bf16.msrb.mxu1 %v3455_v6  ;;  %2346 = vmatpush.bf16.msrb.mxu2 %v3459_v7  ;;  %v4029_v6 = vld [vmem:[#allocation3 + $0x7dc] sm:$0xf0]  ;;  %v4013_v7 = vld [vmem:[#allocation3 + $0x764] sm:$0xf] }
 0x127   : > { %2359 = vmatpush.bf16.msrb.mxu3 %v3463_v11  ;;  %2372 = vmatpush.bf16.msra.mxu0 %v3467_v12  ;;  %v3732_v11 = vld [vmem:[#allocation3 + $0x7e0] sm:$0xf0]  ;;  %v3738_v12 = vld [vmem:[#allocation3 + $0x768] sm:$0xf]  ;;  %v3731_v17 = vor.u32 %v4029_v6, %v3730_v5  ;;  %v3901_v5 = vld [vmem:[#allocation3 + $0x3dc] sm:$0xf0] }
 0x128   : > { %v3735_v21 = vor.u32 %v4013_v7, %v3732_v11  ;;  %v3739_v22 = vor.u32 %v4030_v13, %v3738_v12  ;;  %v3885_v6 = vld [vmem:[#allocation3 + $0x364] sm:$0xf]  ;;  %v3226_v11 = vld [vmem:[#allocation3 + $0x368] sm:$0xf] }
 0x129   : > { %v3902_v12 = vld [vmem:[#allocation3 + $0x3e4] sm:$0xf0] }
 0x12a   : > { %2334 = vmatpush.bf16.msrb.mxu1 %v3327_v19  ;;  %2347 = vmatpush.bf16.msrb.mxu2 %v3331_v20  ;;  %v3596_v19 = vld [vmem:[#allocation3 + $0x6d8] sm:$0xf0]  ;;  %v3602_v20 = vld [vmem:[#allocation3 + $0x660] sm:$0xf] }
 0x12b   : > { %2360 = vmatpush.bf16.msrb.mxu3 %v3335_v23  ;;  %2373 = vmatpush.bf16.msra.mxu0 %v3339_v24  ;;  %v3997_v23 = vld [vmem:[#allocation3 + $0x6dc] sm:$0xf0]  ;;  %v3981_v24 = vld [vmem:[#allocation3 + $0x664] sm:$0xf]  ;;  %v3599_v30 = vor.u32 %v3980_v18, %v3596_v19  ;;  %v3852_v18 = vld [vmem:[#allocation3 + $0x25c] sm:$0xf] }
 0x12c   : > { %v3084_v19 = vld [vmem:[#allocation3 + $0x2d8] sm:$0xf0] }
 0x12e   : > { %2335 = vmatpush.bf16.msrb.mxu1 %v3199_v31  ;;  %2348 = vmatpush.bf16.msrb.mxu2 %v3203_v32  ;;  %v3603_v31 = vor.u32 %v3997_v23, %v3602_v20  ;;  %v3468_v32 = vld [vmem:[#allocation3 + $0x5d8] sm:$0xf0]  ;;  %v3090_v20 = vld [vmem:[#allocation3 + $0x260] sm:$0xf] }
 0x12f   : > { %2361 = vmatpush.bf16.msrb.mxu3 %v3207_v35  ;;  %2374 = vmatpush.bf16.msra.mxu0 %v3211_v36  ;;  %v3607_v35 = vor.u32 %v3981_v24, %v3604_v25  ;;  %v3611_v36 = vor.u32 %v3998_v27, %v3610_v26  ;;  %v3869_v23 = vld [vmem:[#allocation3 + $0x2dc] sm:$0xf0]  ;;  %v3853_v24 = vld [vmem:[#allocation3 + $0x264] sm:$0xf]  ;;  %v3098_v26 = vld [vmem:[#allocation3 + $0x268] sm:$0xf] }
 0x130   : > { %v3092_v25 = vld [vmem:[#allocation3 + $0x2e0] sm:$0xf0]  ;;  %v3870_v27 = vld [vmem:[#allocation3 + $0x2e4] sm:$0xf0] }
 0x132   : > { %2336 = vmatpush.bf16.msrb.mxu1 %v3071_v43  ;;  %2349 = vmatpush.bf16.msrb.mxu2 %v3075_v44  ;;  %v3471_v44 = vor.u32 %v3948_v29, %v3468_v32  ;;  %v3820_v29 = vld [vmem:[#allocation3 + $0x15c] sm:$0xf] }
 0x133   : > { %2362 = vmatpush.bf16.msrb.mxu3 %v3079_v47  ;;  %2375 = vmatpush.bf16.msra.mxu0 %v3083_v48  ;;  %v3916_v48 = vld [vmem:[#allocation3 + $0x45c] sm:$0xf] }
 0x134   : > { %v2956_v32 = vld [vmem:[#allocation3 + $0x1d8] sm:$0xf0] }
 0x136   : > { %2337 = vmatpush.bf16.msrb.mxu1 %v2943_v56  ;;  %2350 = vmatpush.bf16.msrb.mxu2 %v2947_v57  ;;  %v3348_v56 = vld [vmem:[#allocation3 + $0x4e0] sm:$0xf0]  ;;  %v3354_v57 = vld [vmem:[#allocation3 + $0x468] sm:$0xf] }
 0x137   : > { %2363 = vmatpush.bf16.msrb.mxu3 %v2951_v61  ;;  %2376 = vmatpush.bf16.msra.mxu0 %v2955_v62  ;;  %v3343_v61 = vor.u32 %v3916_v48, %v3340_v49  ;;  %v3347_v62 = vor.u32 %v3933_v54, %v3346_v50  ;;  %v3351_v1 = vor.u32 %v3917_v55, %v3348_v56  ;;  %v2834_v48 = vld [vmem:[#allocation3 + $0x60] sm:$0xf]  ;;  %v3789_v54 = vld [vmem:[#allocation3 + $0x64] sm:$0xf] }
 0x138   : > { %v3355_v2 = vor.u32 %v3934_v58, %v3354_v57  ;;  %v2959_v49 = vor.u32 %v3820_v29, %v2956_v32  ;;  %v2963_v50 = vor.u32 %v3837_v38, %v2962_v33  ;;  %v2836_v55 = vld [vmem:[#allocation3 + $0xe0] sm:$0xf0]  ;;  %v3626_v29 = vld [vmem:[#allocation3 + $0x678] sm:$0xf]  ;;  %v3950_v33 = vld [vmem:[#allocation3 + $0x56c] sm:$0xf] }
 0x139   : > { %v471_v43 = vpop.f32.mrf.mxu1  ;;  %v3967_v38 = vld [vmem:[#allocation3 + $0x5ec] sm:$0xf0] }
 0x13a   : > { %2338 = vmatpush.bf16.msrb.mxu1 %v2815_v8  ;;  %2351 = vmatpush.bf16.msrb.mxu2 %v2819_v10  ;;  %v472_v46 = vadd.f32 %v4108_v34, %v471_v43  ;;  %v2119_v47 = vpop.f32.mrf.mxu0  ;;  %v3220_v10 = vld [vmem:[#allocation3 + $0x3e0] sm:$0xf0]  ;;  %v743_v34 = vperm.slane %v4430_v28, 3  ;;  %v2970_v43 = vld [vmem:[#allocation3 + $0x168] sm:$0xf] }
 0x13b   : > { %2364 = vmatpush.bf16.msrb.mxu3 %v2823_v14  ;;  %2377 = vmatpush.bf16.msra.mxu0 %v2827_v15  ;;  %v2120_v53 = vadd.f32 %v2119_v47, %v742_v39  ;;  %v3215_v15 = vor.u32 %v3884_v63, %v3212_v0  ;;  %v3821_v39 = vld [vmem:[#allocation3 + $0x164] sm:$0xf]  ;;  %v2828_v47 = vld [vmem:[#allocation3 + $0xd8] sm:$0xf0]  ;;  %v3746_v63 = vld [vmem:[#allocation3 + $0x770] sm:$0xf] }
 0x13c   : > { %475 = vst.msk [vmem:[%s4445_s22] sm:$0xff] %vm367_vm0, %v472_v46  ;;  %v3788_v46 = vld [vmem:[#allocation3 + $0x5c] sm:$0xf]  ;;  %v2967_v56 = vor.u32 %v3821_v39, %v2964_v42  ;;  %v744_v0 = vperm.slane %v4430_v28, 4  ;;  %v3951_v39 = vld [vmem:[#allocation3 + $0x574] sm:$0xf] }
 0x13d   : > { %2339 = vmatmul.bf16.vlgmr.msrb.gmra.mxu1 %v4402_v9  ;;  %2352 = vmatmul.bf16.vlgmr.msrb.gmra.mxu2 %v4402_v9  ;;  %2502 = vst [vmem:[%s4451_s21 + $0x10] sm:$0xff] %v2120_v53  ;;  %v3805_v53 = vld [vmem:[#allocation3 + $0xdc] sm:$0xf0]  ;;  %v3498_v42 = vld [vmem:[#allocation3 + $0x578] sm:$0xf] }
 0x13e   : > { %2383 = vmatpush.bf16.msra.mxu1 %v3727_v16  ;;  %2396 = vmatpush.bf16.msra.mxu2 %v3731_v17  ;;  %v3219_v16 = vor.u32 %v3901_v5, %v3218_v4  ;;  %v2831_v4 = vor.u32 %v3788_v46, %v2828_v47  ;;  %v2835_v5 = vor.u32 %v3805_v53, %v2834_v48  ;;  %v747_v48 = vperm.slane %v4430_v28, 7 }
 0x13f   : > { %2409 = vmatpush.bf16.msra.mxu3 %v3735_v21  ;;  %2422 = vmatpush.bf16.msrb.mxu0 %v3739_v22  ;;  %v2093_v3 = vpop.f32.mrf.mxu2  ;;  %v3223_v21 = vor.u32 %v3885_v6, %v3220_v10  ;;  %v3227_v22 = vor.u32 %v3902_v12, %v3226_v11  ;;  %v3748_v6 = vld [vmem:[#allocation3 + $0x7f0] sm:$0xf0]  ;;  %v2839_v10 = vor.u32 %v3789_v54, %v2836_v55  ;;  %v3362_v54 = vld [vmem:[#allocation3 + $0x470] sm:$0xf] }
 0x140   : > { %2365 = vmatmul.bf16.vlgmr.msrb.gmra.mxu3 %v4402_v9  ;;  %2378 = vmatmul.bf16.vlgmr.msra.gmra.mxu0 %v4402_v9  ;;  %v2094_v7 = vadd.f32 %v2093_v3, %v740_v59  ;;  %v2106_v8 = vpop.f32.mrf.mxu3  ;;  %v2842_v59 = vld [vmem:[#allocation3 + $0x68] sm:$0xf]  ;;  %v745_v3 = vperm.slane %v4430_v28, 5  ;;  %v3935_v55 = vld [vmem:[#allocation3 + $0x4ec] sm:$0xf0] }
 0x141   : > { %v2107_v13 = vadd.f32 %v2106_v8, %v741_v60  ;;  %v473_v14 = vpop.f32.mrf.mxu1  ;;  %v3806_v60 = vld [vmem:[#allocation3 + $0xe4] sm:$0xf0]  ;;  %v4032_v8 = vld [vmem:[#allocation3 + $0x7f4] sm:$0xf0] }
 0x142   : > { %2384 = vmatpush.bf16.msra.mxu1 %v3599_v30  ;;  %2397 = vmatpush.bf16.msra.mxu2 %v3603_v31  ;;  %2500 = vst [vmem:[%s4451_s21] sm:$0xff] %v2094_v7  ;;  %v2121_v17 = vpop.f32.mrf.mxu0  ;;  %v3087_v30 = vor.u32 %v3852_v18, %v3084_v19  ;;  %v3091_v31 = vor.u32 %v3869_v23, %v3090_v20  ;;  %v3754_v7 = vld [vmem:[#allocation3 + $0x778] sm:$0xf]  ;;  %v3612_v18 = vld [vmem:[#allocation3 + $0x6e8] sm:$0xf0]  ;;  %v3618_v19 = vld [vmem:[#allocation3 + $0x670] sm:$0xf] }
 0x143   : > { %2410 = vmatpush.bf16.msra.mxu3 %v3607_v35  ;;  %2423 = vmatpush.bf16.msrb.mxu0 %v3611_v36  ;;  %2501 = vst [vmem:[%s4451_s21 + $0x8] sm:$0xff] %v2107_v13  ;;  %v3095_v35 = vor.u32 %v3853_v24, %v3092_v25  ;;  %v3099_v36 = vor.u32 %v3870_v27, %v3098_v26  ;;  %v3982_v17 = vld [vmem:[#allocation3 + $0x66c] sm:$0xf]  ;;  %v3999_v24 = vld [vmem:[#allocation3 + $0x6ec] sm:$0xf0] }
 0x144   : > { %v2843_v11 = vor.u32 %v3806_v60, %v2842_v59  ;;  %v3983_v25 = vld [vmem:[#allocation3 + $0x674] sm:$0xf]  ;;  %v3619_v32 = vor.u32 %v3999_v24, %v3618_v19  ;;  %v3936_v59 = vld [vmem:[#allocation3 + $0x4f4] sm:$0xf0] }
 0x145   : > { %v3620_v26 = vld [vmem:[#allocation3 + $0x6f0] sm:$0xf0] }
 0x146   : > { %2385 = vmatpush.bf16.msra.mxu1 %v3471_v44  ;;  %2398 = vmatpush.bf16.msra.mxu2 %v3475_v45  ;;  %v3838_v44 = vld [vmem:[#allocation3 + $0x1e4] sm:$0xf0] }
 0x147   : > { %2411 = vmatpush.bf16.msra.mxu3 %v3479_v51  ;;  %2424 = vmatpush.bf16.msrb.mxu0 %v3483_v52  ;;  %v2095_v37 = vpop.f32.mrf.mxu2  ;;  %v2971_v57 = vor.u32 %v3838_v44, %v2970_v43  ;;  %v3968_v43 = vld [vmem:[#allocation3 + $0x5f4] sm:$0xf0] }
 0x148   : > { %v2108_v41 = vpop.f32.mrf.mxu3  ;;  %v3499_v53 = vor.u32 %v3968_v43, %v3498_v42  ;;  %v3823_v42 = vld [vmem:[#allocation3 + $0x174] sm:$0xf] }
 0x149   : > { %v2132_v45 = vpop.f32.mrf.mxu1  ;;  %v3492_v41 = vld [vmem:[#allocation3 + $0x5f0] sm:$0xf0] }
 0x14a   : > { %2386 = vmatpush.bf16.msra.mxu1 %v3343_v61  ;;  %2399 = vmatpush.bf16.msra.mxu2 %v3347_v62  ;;  %v2133_v51 = vadd.f32 %v2132_v45, %v743_v34  ;;  %v2171_v52 = vpop.f32.mrf.mxu0  ;;  %v4014_v61 = vld [vmem:[#allocation3 + $0x76c] sm:$0xf]  ;;  %v2980_v43 = vld [vmem:[#allocation3 + $0x1f0] sm:$0xf0] }
 0x14b   : > { %2412 = vmatpush.bf16.msra.mxu3 %v3351_v1  ;;  %2425 = vmatpush.bf16.msrb.mxu0 %v3355_v2  ;;  %v2172_v58 = vadd.f32 %v2171_v52, %v746_v40  ;;  %v3740_v62 = vld [vmem:[#allocation3 + $0x7e8] sm:$0xf0]  ;;  %v4031_v1 = vld [vmem:[#allocation3 + $0x7ec] sm:$0xf0]  ;;  %v4015_v2 = vld [vmem:[#allocation3 + $0x774] sm:$0xf]  ;;  %v3495_v52 = vor.u32 %v3951_v39, %v3492_v41 }
 0x14c   : > { %2503 = vst [vmem:[%s4451_s21 + $0x18] sm:$0xff] %v2133_v51  ;;  %v3743_v13 = vor.u32 %v4014_v61, %v3740_v62  ;;  %v3747_v14 = vor.u32 %v4031_v1, %v3746_v63  ;;  %v3751_v20 = vor.u32 %v4015_v2, %v3748_v6  ;;  %v3484_v34 = vld [vmem:[#allocation3 + $0x5e8] sm:$0xf0]  ;;  %v3363_v63 = vor.u32 %v3935_v55, %v3362_v54  ;;  %v3234_v2 = vld [vmem:[#allocation3 + $0x370] sm:$0xf] }
 0x14d   : > { %2506 = vst [vmem:[%s4451_s21 + $0x30] sm:$0xff] %v2172_v58  ;;  %v4468_v40 = vld [vmem:[%s4589_s6 + $0x8] sm:$0xff]  ;;  %v3487_v45 = vor.u32 %v3950_v33, %v3484_v34  ;;  %v3370_v58 = vld [vmem:[#allocation3 + $0x478] sm:$0xf]  ;;  %v3903_v6 = vld [vmem:[#allocation3 + $0x3ec] sm:$0xf0] }
 0x14e   : > { %2387 = vmatpush.bf16.msra.mxu1 %v3215_v15  ;;  %2400 = vmatpush.bf16.msra.mxu2 %v3219_v16  ;;  %v3356_v51 = vld [vmem:[#allocation3 + $0x4e8] sm:$0xf0]  ;;  %v3839_v41 = vld [vmem:[#allocation3 + $0x1ec] sm:$0xf0]  ;;  %v3791_v55 = vld [vmem:[#allocation3 + $0x74] sm:$0xf] }
 0x14f   : > { %2413 = vmatpush.bf16.msra.mxu3 %v3223_v21  ;;  %2426 = vmatpush.bf16.msrb.mxu0 %v3227_v22  ;;  %v2145_v12 = vpop.f32.mrf.mxu2  ;;  %v3755_v21 = vor.u32 %v4032_v8, %v3754_v7  ;;  %v3228_v1 = vld [vmem:[#allocation3 + $0x3e8] sm:$0xf0]  ;;  %v3887_v7 = vld [vmem:[#allocation3 + $0x374] sm:$0xf]  ;;  %v3807_v54 = vld [vmem:[#allocation3 + $0xec] sm:$0xf0] }
 0x150   : > { %v2146_v15 = vadd.f32 %v2145_v12, %v744_v0  ;;  %v2158_v16 = vpop.f32.mrf.mxu3  ;;  %v3886_v0 = vld [vmem:[#allocation3 + $0x36c] sm:$0xf]  ;;  %v3236_v8 = vld [vmem:[#allocation3 + $0x3f0] sm:$0xf0]  ;;  %v748_v12 = vperm.slane %v4468_v40, 0 }
 0x151   : > { %v2159_v22 = vadd.f32 %v2158_v16, %v745_v3  ;;  %v2134_v23 = vpop.f32.mrf.mxu1  ;;  %v3854_v16 = vld [vmem:[#allocation3 + $0x26c] sm:$0xf] }
 0x152   : > { %2388 = vmatpush.bf16.msra.mxu1 %v3087_v30  ;;  %2401 = vmatpush.bf16.msra.mxu2 %v3091_v31  ;;  %2504 = vst [vmem:[%s4451_s21 + $0x20] sm:$0xff] %v2146_v15  ;;  %v2173_v27 = vpop.f32.mrf.mxu0  ;;  %v4000_v30 = vld [vmem:[#allocation3 + $0x6f4] sm:$0xf0]  ;;  %v3615_v31 = vor.u32 %v3982_v17, %v3612_v18  ;;  %v3235_v15 = vor.u32 %v3903_v6, %v3234_v2  ;;  %v3100_v17 = vld [vmem:[#allocation3 + $0x2e8] sm:$0xf0] }
 0x153   : > { %2414 = vmatpush.bf16.msra.mxu3 %v3095_v35  ;;  %2427 = vmatpush.bf16.msrb.mxu0 %v3099_v36  ;;  %2505 = vst [vmem:[%s4451_s21 + $0x28] sm:$0xff] %v2159_v22  ;;  %v3490_v35 = vld [vmem:[#allocation3 + $0x570] sm:$0xf]  ;;  %v3623_v36 = vor.u32 %v3983_v25, %v3620_v26  ;;  %v3627_v37 = vor.u32 %v4000_v30, %v3626_v29  ;;  %v3855_v23 = vld [vmem:[#allocation3 + $0x274] sm:$0xf] }
 0x154   : > { %v3491_v46 = vor.u32 %v3967_v38, %v3490_v35  ;;  %v3239_v18 = vor.u32 %v3887_v7, %v3236_v8  ;;  %v3871_v22 = vld [vmem:[#allocation3 + $0x2ec] sm:$0xf0]  ;;  %v3108_v26 = vld [vmem:[#allocation3 + $0x2f0] sm:$0xf0]  ;;  %v3114_v27 = vld [vmem:[#allocation3 + $0x278] sm:$0xf]  ;;  %v3103_v34 = vor.u32 %v3854_v16, %v3100_v17 }
 0x155   : > { %v3872_v29 = vld [vmem:[#allocation3 + $0x2f4] sm:$0xf0]  ;;  %v3111_v38 = vor.u32 %v3855_v23, %v3108_v26  ;;  %v3984_v2 = vld [vmem:[#allocation3 + $0x67c] sm:$0xf]  ;;  %v751_v8 = vperm.slane %v4468_v40, 3 }
 0x156   : > { %2389 = vmatpush.bf16.msra.mxu1 %v2959_v49  ;;  %2402 = vmatpush.bf16.msra.mxu2 %v2963_v50  ;;  %v750_v49 = vperm.slane %v4468_v40, 2  ;;  %v3918_v50 = vld [vmem:[#allocation3 + $0x46c] sm:$0xf]  ;;  %v3115_v39 = vor.u32 %v3872_v29, %v3114_v27  ;;  %v3500_v6 = vld [vmem:[#allocation3 + $0x5f8] sm:$0xf0] }
 0x157   : > { %2415 = vmatpush.bf16.msra.mxu3 %v2967_v56  ;;  %2428 = vmatpush.bf16.msrb.mxu0 %v2971_v57  ;;  %v2147_v44 = vpop.f32.mrf.mxu2  ;;  %v3919_v56 = vld [vmem:[#allocation3 + $0x474] sm:$0xf]  ;;  %v3359_v62 = vor.u32 %v3918_v50, %v3356_v51  ;;  %v2983_v50 = vor.u32 %v3823_v42, %v2980_v43  ;;  %v755_v43 = vperm.slane %v4468_v40, 7 }
 0x158   : > { %v2160_v47 = vpop.f32.mrf.mxu3  ;;  %v3364_v57 = vld [vmem:[#allocation3 + $0x4f0] sm:$0xf0]  ;;  %v2986_v44 = vld [vmem:[#allocation3 + $0x178] sm:$0xf] }
 0x159   : > { %v4498_v42 = vld [vmem:[%s4589_s6 + $0x10] sm:$0xff] }
 0x15a   : > { %2390 = vmatpush.bf16.msra.mxu1 %v2831_v4  ;;  %2403 = vmatpush.bf16.msra.mxu2 %v2835_v5  ;;  %v2184_v60 = vpop.f32.mrf.mxu1  ;;  %v3367_v4 = vor.u32 %v3919_v56, %v3364_v57  ;;  %v3371_v5 = vor.u32 %v3936_v59, %v3370_v58  ;;  %v2852_v57 = vld [vmem:[#allocation3 + $0xf0] sm:$0xf0]  ;;  %v2858_v58 = vld [vmem:[#allocation3 + $0x78] sm:$0xf] }
 0x15b   : > { %2416 = vmatpush.bf16.msra.mxu3 %v2839_v10  ;;  %2429 = vmatpush.bf16.msrb.mxu0 %v2843_v11  ;;  %v2185_v61 = vadd.f32 %v2184_v60, %v747_v48  ;;  %v3242_v10 = vld [vmem:[#allocation3 + $0x378] sm:$0xf]  ;;  %v3790_v48 = vld [vmem:[#allocation3 + $0x6c] sm:$0xf]  ;;  %v4016_v60 = vld [vmem:[#allocation3 + $0x77c] sm:$0xf] }
 0x15c   : > { %v3904_v11 = vld [vmem:[#allocation3 + $0x3f4] sm:$0xf0] }
 0x15d   : > { %2391 = vmatmul.bf16.vlgmr.msra.gmra.mxu1 %v4402_v9  ;;  %2404 = vmatmul.bf16.vlgmr.msra.gmra.mxu2 %v4402_v9  ;;  %v2223_v28 = vpop.f32.mrf.mxu0  ;;  %2507 = vst [vmem:[%s4451_s21 + $0x38] sm:$0xff] %v2185_v61  ;;  %v3243_v19 = vor.u32 %v3904_v11, %v3242_v10  ;;  %v3808_v59 = vld [vmem:[#allocation3 + $0xf4] sm:$0xf0]  ;;  %v3756_v61 = vld [vmem:[#allocation3 + $0x7f8] sm:$0xf0]  ;;  %v754_v10 = vperm.slane %v4468_v40, 6 }
 0x15e   : > { %2435 = vmatpush.bf16.msrb.mxu1 %v3743_v13  ;;  %2448 = vmatpush.bf16.msrb.mxu2 %v3747_v14  ;;  %v2224_v3 = vadd.f32 %v2223_v28, %v750_v49  ;;  %v749_v13 = vperm.slane %v4468_v40, 1  ;;  %v3231_v14 = vor.u32 %v3886_v0, %v3228_v1  ;;  %v2844_v49 = vld [vmem:[#allocation3 + $0xe8] sm:$0xf0]  ;;  %v2859_v0 = vor.u32 %v3808_v59, %v2858_v58  ;;  %v3920_v11 = vld [vmem:[#allocation3 + $0x47c] sm:$0xf] }
 0x15f   : > { %2461 = vmatpush.bf16.msrb.mxu3 %v3751_v20  ;;  %2474 = vmatpush.bf16.msra.mxu0 %v3755_v21  ;;  %v3106_v21 = vld [vmem:[#allocation3 + $0x270] sm:$0xf]  ;;  %v2847_v28 = vor.u32 %v3790_v48, %v2844_v49  ;;  %v3759_v1 = vor.u32 %v4016_v60, %v3756_v61 }
 0x160   : > { %2417 = vmatmul.bf16.vlgmr.msra.gmra.mxu3 %v4402_v9  ;;  %2430 = vmatmul.bf16.vlgmr.msrb.gmra.mxu0 %v4402_v9  ;;  %2510 = vst [vmem:[%s4451_s21 + $0x50] sm:$0xff] %v2224_v3  ;;  %v2197_v20 = vpop.f32.mrf.mxu2  ;;  %v3107_v35 = vor.u32 %v3871_v22, %v3106_v21  ;;  %v3628_v3 = vld [vmem:[#allocation3 + $0x6f8] sm:$0xf0]  ;;  %v753_v21 = vperm.slane %v4468_v40, 5 }
 0x161   : > { %v2198_v24 = vadd.f32 %v2197_v20, %v748_v12  ;;  %v3372_v12 = vld [vmem:[#allocation3 + $0x4f8] sm:$0xf0]  ;;  %v752_v20 = vperm.slane %v4468_v40, 4 }
 0x162   : > { %2436 = vmatpush.bf16.msrb.mxu1 %v3615_v31  ;;  %2449 = vmatpush.bf16.msrb.mxu2 %v3619_v32  ;;  %v2186_v31 = vpop.f32.mrf.mxu1  ;;  %v3822_v32 = vld [vmem:[#allocation3 + $0x16c] sm:$0xf]  ;;  %v3375_v16 = vor.u32 %v3920_v11, %v3372_v12 }
 0x163   : > { %2462 = vmatpush.bf16.msrb.mxu3 %v3623_v36  ;;  %2475 = vmatpush.bf16.msra.mxu0 %v3627_v37  ;;  %v2210_v25 = vpop.f32.mrf.mxu3  ;;  %2508 = vst [vmem:[%s4451_s21 + $0x40] sm:$0xff] %v2198_v24  ;;  %v2972_v36 = vld [vmem:[#allocation3 + $0x1e8] sm:$0xf0]  ;;  %v2978_v37 = vld [vmem:[#allocation3 + $0x170] sm:$0xf] }
 0x164   : > { %v2211_v30 = vadd.f32 %v2210_v25, %v749_v13  ;;  %v2979_v47 = vor.u32 %v3839_v41, %v2978_v37  ;;  %v3856_v24 = vld [vmem:[#allocation3 + $0x27c] sm:$0xf] }
 0x165   : > { %v2225_v33 = vpop.f32.mrf.mxu0  ;;  %v3116_v25 = vld [vmem:[#allocation3 + $0x2f8] sm:$0xf0] }
 0x166   : > { %2437 = vmatpush.bf16.msrb.mxu1 %v3487_v45  ;;  %2450 = vmatpush.bf16.msrb.mxu2 %v3491_v46  ;;  %2509 = vst [vmem:[%s4451_s21 + $0x48] sm:$0xff] %v2211_v30  ;;  %v3840_v45 = vld [vmem:[#allocation3 + $0x1f4] sm:$0xf0]  ;;  %v2975_v46 = vor.u32 %v3822_v32, %v2972_v36  ;;  %v3119_v32 = vor.u32 %v3856_v24, %v3116_v25  ;;  %v3824_v33 = vld [vmem:[#allocation3 + $0x17c] sm:$0xf] }
 0x167   : > { %2463 = vmatpush.bf16.msrb.mxu3 %v3495_v52  ;;  %2476 = vmatpush.bf16.msra.mxu0 %v3499_v53  ;;  %v2987_v51 = vor.u32 %v3840_v45, %v2986_v44  ;;  %v2850_v53 = vld [vmem:[#allocation3 + $0x70] sm:$0xf]  ;;  %v3792_v37 = vld [vmem:[#allocation3 + $0x7c] sm:$0xf]  ;;  %v758_v44 = vperm.slane %v4498_v42, 2 }
 0x168   : > { %v2199_v52 = vpop.f32.mrf.mxu2 }
 0x16a   : > { %2438 = vmatpush.bf16.msrb.mxu1 %v3359_v62  ;;  %2451 = vmatpush.bf16.msrb.mxu2 %v3363_v63  ;;  %v2851_v62 = vor.u32 %v3807_v54, %v2850_v53  ;;  %v2855_v63 = vor.u32 %v3791_v55, %v2852_v57 }
 0x16b   : > { %2464 = vmatpush.bf16.msrb.mxu3 %v3367_v4  ;;  %2477 = vmatpush.bf16.msra.mxu0 %v3371_v5  ;;  %v2212_v56 = vpop.f32.mrf.mxu3  ;;  %v3631_v4 = vor.u32 %v3984_v2, %v3628_v3  ;;  %v3952_v5 = vld [vmem:[#allocation3 + $0x57c] sm:$0xf] }
 0x16c   : > { %v3503_v7 = vor.u32 %v3952_v5, %v3500_v6 }
 0x16e   : > { %2439 = vmatpush.bf16.msrb.mxu1 %v3231_v14  ;;  %2452 = vmatpush.bf16.msrb.mxu2 %v3235_v15 }
 0x16f   : > { %2465 = vmatpush.bf16.msrb.mxu3 %v3239_v18  ;;  %2478 = vmatpush.bf16.msra.mxu0 %v3243_v19  ;;  %v3888_v18 = vld [vmem:[#allocation3 + $0x37c] sm:$0xf] }
 0x170   : > { %v3244_v19 = vld [vmem:[#allocation3 + $0x3f8] sm:$0xf0] }
 0x171   : > { %v3247_v22 = vor.u32 %v3888_v18, %v3244_v19 }
 0x172   : > { %2440 = vmatpush.bf16.msrb.mxu1 %v3103_v34  ;;  %2453 = vmatpush.bf16.msrb.mxu2 %v3107_v35  ;;  %v2988_v34 = vld [vmem:[#allocation3 + $0x1f8] sm:$0xf0] }
 0x173   : > { %2466 = vmatpush.bf16.msrb.mxu3 %v3111_v38  ;;  %2479 = vmatpush.bf16.msra.mxu0 %v3115_v39  ;;  %v2991_v35 = vor.u32 %v3824_v33, %v2988_v34  ;;  %v2860_v38 = vld [vmem:[#allocation3 + $0xf8] sm:$0xf0] }
 0x174   : > { %v2863_v41 = vor.u32 %v3792_v37, %v2860_v38 }
 0x176   : > { %2441 = vmatpush.bf16.msrb.mxu1 %v2975_v46  ;;  %2454 = vmatpush.bf16.msrb.mxu2 %v2979_v47 }
 0x177   : > { %2467 = vmatpush.bf16.msrb.mxu3 %v2983_v50  ;;  %2480 = vmatpush.bf16.msra.mxu0 %v2987_v51 }
 0x17a   : > { %2442 = vmatpush.bf16.msrb.mxu1 %v2847_v28  ;;  %2455 = vmatpush.bf16.msrb.mxu2 %v2851_v62  ;;  %v2236_v13 = vpop.f32.mrf.mxu1 }
 0x17b   : > { %2468 = vmatpush.bf16.msrb.mxu3 %v2855_v63  ;;  %2481 = vmatpush.bf16.msra.mxu0 %v2859_v0  ;;  %v2237_v14 = vadd.f32 %v2236_v13, %v751_v8 }
 0x17d   : > { %2443 = vmatmul.bf16.vlgmr.msrb.gmra.mxu1 %v4402_v9  ;;  %2456 = vmatmul.bf16.vlgmr.msrb.gmra.mxu2 %v4402_v9  ;;  %v2275_v15 = vpop.f32.mrf.mxu0  ;;  %2511 = vst [vmem:[%s4451_s21 + $0x58] sm:$0xff] %v2237_v14 }
 0x17e   : > { %2487 = vmatpush.bf16.msra.mxu1 %v3759_v1  ;;  %2469 = vmatmul.bf16.vlgmr.msrb.gmra.mxu3 %v4402_v9  ;;  %v2276_v17 = vadd.f32 %v2275_v15, %v754_v10 }
 0x17f   : > { %2482 = vmatmul.bf16.vlgmr.msra.gmra.mxu0 %v4402_v9 }
 0x180   : > { %2514 = vst [vmem:[%s4451_s21 + $0x70] sm:$0xff] %v2276_v17  ;;  %v2249_v23 = vpop.f32.mrf.mxu2 }
 0x181   : > { %v2250_v26 = vadd.f32 %v2249_v23, %v752_v20 }
 0x182   : > { %2488 = vmatpush.bf16.msra.mxu1 %v3631_v4  ;;  %v2238_v30 = vpop.f32.mrf.mxu1 }
 0x183   : > { %v2262_v27 = vpop.f32.mrf.mxu3  ;;  %2512 = vst [vmem:[%s4451_s21 + $0x60] sm:$0xff] %v2250_v26 }
 0x184   : > { %v2263_v29 = vadd.f32 %v2262_v27, %v753_v21 }
 0x185   : > { %v2277_v31 = vpop.f32.mrf.mxu0 }
 0x186   : > { %2489 = vmatpush.bf16.msra.mxu1 %v3503_v7  ;;  %2513 = vst [vmem:[%s4451_s21 + $0x68] sm:$0xff] %v2263_v29 }
 0x188   : > { %v2251_v36 = vpop.f32.mrf.mxu2 }
 0x18a   : > { %2490 = vmatpush.bf16.msra.mxu1 %v3375_v16 }
 0x18b   : > { %v2264_v39 = vpop.f32.mrf.mxu3 }
 0x18e   : > { %2491 = vmatpush.bf16.msra.mxu1 %v3247_v22 }
 0x192   : > { %2492 = vmatpush.bf16.msra.mxu1 %v3119_v32 }
 0x196   : > { %2493 = vmatpush.bf16.msra.mxu1 %v2991_v35 }
 0x19a   : > { %2494 = vmatpush.bf16.msra.mxu1 %v2863_v41  ;;  %v2288_v45 = vpop.f32.mrf.mxu1 }
 0x19b   : > { %v2289_v46 = vadd.f32 %v2288_v45, %v755_v43 }
 0x19d   : > { %2495 = vmatmul.bf16.vlgmr.msra.gmra.mxu1 %v4402_v9  ;;  %v2327_v9 = vpop.f32.mrf.mxu0 }
 0x19e   : > { %v2328_v47 = vadd.f32 %v2327_v9, %v758_v44 }
 0x19f   : > { %4168 = shalt.err (!%p4165_p9)
}
 0x1a0   : > { %4039 = dma.vmem_to_hbm [thread:$0]  (%p4345_p4), %s2568_s19, 128, %s2570_s20, %s2538_s23   ;;  %2515 = vst [vmem:[%s4451_s21 + $0x78] sm:$0xff] %v2289_v46  ;;  %v756_v40 = vperm.slane %v4498_v42, 0  ;;  %v757_v48 = vperm.slane %v4498_v42, 1  ;;  %v2301_v49 = vpop.f32.mrf.mxu2  ;;  %v759_v57 = vperm.slane %v4498_v42, 3  ;;  %v762_v58 = vperm.slane %v4498_v42, 6 }
 0x1a1   : > { %2518 = vst [vmem:[%s4451_s21 + $0x90] sm:$0xff] %v2328_v47  ;;  %v760_v62 = vperm.slane %v4498_v42, 4  ;;  %v761_v63 = vperm.slane %v4498_v42, 5  ;;  %v735_v8 = vld [vmem:[%s4589_s6 + $0x18] sm:$0xff]  ;;  %v763_v10 = vperm.slane %v4498_v42, 7  ;;  %s4033_s20 = sshll.u32 %s4247_s30, 8 }
 0x1a2   : > { %v2302_v50 = vadd.f32 %v2301_v49, %v756_v40  ;;  %v2290_v53 = vpop.f32.mrf.mxu1  ;;  %v766_v11 = vperm.slane %v735_v8, 2  ;;  %v764_v16 = vperm.slane %v735_v8, 0  ;;  %v765_v17 = vperm.slane %v735_v8, 1  ;;  %s2551_s25 = scalar_lea.hbm %s4590_s7, %s4033_s20  ;;  %s2553_s5 = sshll.u32 %s4451_s21, 4  ;;  %s2554_s5 = int_to_ptr.vmem [resolvable:$true] %s2553_s5 }
 0x1a3   : > { %v2314_v51 = vpop.f32.mrf.mxu3  ;;  %v767_v26 = vperm.slane %v735_v8, 3  ;;  %v770_v27 = vperm.slane %v735_v8, 6  ;;  %v768_v33 = vperm.slane %v735_v8, 4  ;;  %v769_v34 = vperm.slane %v735_v8, 5  ;;  %s2555_s11 = sshll.u32 %s2551_s25, 4  ;;  %s2533_s12 = scalar_lea.sflag [#allocation5], %s4425_s26  ;;  %s2556_s11 = int_to_ptr.hbm [resolvable:$true] %s2555_s11 }
 0x1a4   : > { %v2315_v52 = vadd.f32 %v2314_v51, %v757_v48  ;;  %2516 = vst [vmem:[%s4451_s21 + $0x80] sm:$0xff] %v2302_v50  ;;  %v771_v44 = vperm.slane %v735_v8, 7  ;;  %s4183_s14 = sshra.s32 %s2556_s11, 4  ;;  %s4189_s19 = scalar_lea.hbm %s4590_s7, 512  ;;  %s4184_s14 = int_to_ptr.hbm [resolvable:$true] %s4183_s14 }
 0x1a5   : > { %v2329_v54 = vpop.f32.mrf.mxu0  ;;  %s4185_s22 = scalar_lea.hbm %s4184_s14, 256  ;;  %p4190_p13 = scmp.lt.s32.totalorder %s4184_s14, %s4590_s7 }
 0x1a6   : > { %2517 = vst [vmem:[%s4451_s21 + $0x88] sm:$0xff] %v2315_v52  ;;  %p4186_p10 = scmp.ne.s32.totalorder %s4184_s14, %s4185_s22  ;;  %p4191_p0 = scmp.lt.s32.totalorder %s4189_s19, %s4185_s22 }
 0x1a8   : > { %v2303_v55 = vpop.f32.mrf.mxu2  ;;  %p4187_p11 = pnand %p4186_p10, %p4345_p4  ;;  %p4192_p1 = por %p4191_p0, %p4190_p13 }
 0x1aa   : > { %p4188_p12 = pneg %p4187_p11 }
 0x1ab   : > { %v2316_v56 = vpop.f32.mrf.mxu3 }
 0x1ac   : > { %p4193_p2 = pnand %p4192_p1, %p4188_p12 }
 0x1ba   : > { %v2340_v59 = vpop.f32.mrf.mxu1 }
 0x1bb   : > { %v2341_v60 = vadd.f32 %v2340_v59, %v759_v57 }
 0x1bd   : > { %v2379_v61 = vpop.f32.mrf.mxu0  ;;  %2519 = vst [vmem:[%s4451_s21 + $0x98] sm:$0xff] %v2341_v60 }
 0x1be   : > { %v2380_v28 = vadd.f32 %v2379_v61, %v762_v58 }
 0x1c0   : > { %2522 = vst [vmem:[%s4451_s21 + $0xb0] sm:$0xff] %v2380_v28  ;;  %v2353_v0 = vpop.f32.mrf.mxu2 }
 0x1c1   : > { %v2354_v1 = vadd.f32 %v2353_v0, %v760_v62 }
 0x1c2   : > { %v2342_v4 = vpop.f32.mrf.mxu1 }
 0x1c3   : > { %v2366_v2 = vpop.f32.mrf.mxu3  ;;  %2520 = vst [vmem:[%s4451_s21 + $0xa0] sm:$0xff] %v2354_v1 }
 0x1c4   : > { %v2367_v3 = vadd.f32 %v2366_v2, %v761_v63 }
 0x1c5   : > { %v2381_v5 = vpop.f32.mrf.mxu0 }
 0x1c6   : > { %2521 = vst [vmem:[%s4451_s21 + $0xa8] sm:$0xff] %v2367_v3 }
 0x1c8   : > { %v2355_v6 = vpop.f32.mrf.mxu2 }
 0x1cb   : > { %v2368_v7 = vpop.f32.mrf.mxu3 }
 0x1da   : > { %v2392_v12 = vpop.f32.mrf.mxu1 }
 0x1db   : > { %v2393_v13 = vadd.f32 %v2392_v12, %v763_v10 }
 0x1dd   : > { %v2431_v14 = vpop.f32.mrf.mxu0  ;;  %2523 = vst [vmem:[%s4451_s21 + $0xb8] sm:$0xff] %v2393_v13 }
 0x1de   : > { %v2432_v15 = vadd.f32 %v2431_v14, %v766_v11 }
 0x1e0   : > { %2526 = vst [vmem:[%s4451_s21 + $0xd0] sm:$0xff] %v2432_v15  ;;  %v2405_v18 = vpop.f32.mrf.mxu2 }
 0x1e1   : > { %v2406_v19 = vadd.f32 %v2405_v18, %v764_v16 }
 0x1e2   : > { %v2394_v22 = vpop.f32.mrf.mxu1 }
 0x1e3   : > { %v2418_v20 = vpop.f32.mrf.mxu3  ;;  %2524 = vst [vmem:[%s4451_s21 + $0xc0] sm:$0xff] %v2406_v19 }
 0x1e4   : > { %v2419_v21 = vadd.f32 %v2418_v20, %v765_v17 }
 0x1e5   : > { %v2433_v23 = vpop.f32.mrf.mxu0 }
 0x1e6   : > { %2525 = vst [vmem:[%s4451_s21 + $0xc8] sm:$0xff] %v2419_v21 }
 0x1e8   : > { %v2407_v24 = vpop.f32.mrf.mxu2 }
 0x1eb   : > { %v2420_v25 = vpop.f32.mrf.mxu3 }
 0x1fa   : > { %v2444_v29 = vpop.f32.mrf.mxu1 }
 0x1fb   : > { %v2445_v30 = vadd.f32 %v2444_v29, %v767_v26 }
 0x1fc   : > { %v2483_v31 = vpop.f32.mrf.mxu0 }
 0x1fd   : > { %v2484_v32 = vadd.f32 %v2483_v31, %v770_v27  ;;  %2527 = vst [vmem:[%s4451_s21 + $0xd8] sm:$0xff] %v2445_v30 }
 0x1ff   : > { %2530 = vst [vmem:[%s4451_s21 + $0xf0] sm:$0xff] %v2484_v32 }
 0x200   : > { %v2457_v35 = vpop.f32.mrf.mxu2 }
 0x201   : > { %v2458_v36 = vadd.f32 %v2457_v35, %v768_v33  ;;  %v2470_v37 = vpop.f32.mrf.mxu3 }
 0x202   : > { %v2471_v38 = vadd.f32 %v2470_v37, %v769_v34  ;;  %v2446_v39 = vpop.f32.mrf.mxu1 }
 0x203   : > { %2528 = vst [vmem:[%s4451_s21 + $0xe0] sm:$0xff] %v2458_v36 }
 0x204   : > { %v2485_v41 = vpop.f32.mrf.mxu0  ;;  %2529 = vst [vmem:[%s4451_s21 + $0xe8] sm:$0xff] %v2471_v38 }
 0x208   : > { %v2459_v42 = vpop.f32.mrf.mxu2 }
 0x209   : > { %v2472_v43 = vpop.f32.mrf.mxu3 }
 0x21a   : > { %v2496_v45 = vpop.f32.mrf.mxu1 }
 0x21b   : > { %v2497_v46 = vadd.f32 %v2496_v45, %v771_v44 }
 0x21d   : > { %2531 = vst [vmem:[%s4451_s21 + $0xf8] sm:$0xff] %v2497_v46 }
 0x21e   : > { %4196 = shalt.err (!%p4193_p2)
}
 0x21f   : > { %4038 = dma.vmem_to_hbm [thread:$0]  (%p4345_p4), %s2554_s5, 4096, %s2556_s11, %s2533_s12  }
 0x222   : > { %v2498_v9 = vpop.f32.mrf.mxu1 }
 0x223 PF: > { %p4055_p3 = scmp.ge.s32.totalorder %s4255_s10, 2  ;;  %s2581_s26 = sand.u32 1, %s4235_s27  }
 0x224   : > { %s2582_s21 = scalar_lea.sflag [#allocation5], %s2581_s26 }
 0x225   : > { %p4047_p5 = pnand %p4055_p3, %p4352_p8 }
 0x227   : > { %p4048_p6 = pneg %p4047_p5 }
 0x229   : > { %4226 = dma.done.wait (%p4048_p6), %s2582_s21, 4096  }
 0x22a   : > { %4228 = vsyncadd (%p4048_p6), %s2582_s21, 4294963200  ;;  %s2592_s24 = scalar_lea.sflag [#allocation8], %s2581_s26 }
 0x22b   : > { %4230 = dma.done.wait (%p4048_p6), %s2592_s24, 128  }
 0x22c   : > { %4232 = vsyncadd (%p4048_p6), %s2592_s24, 4294967168  ;;  %s26_s10 = sadd.s32 1, %s4255_s10   ;;  %s4596_s27 = smov %s4239_s28 }
 0x22d   : > { %p23_p7 = scmp.ge.s32.totalorder %s26_s10, 4   ;;  %s4597_s28 = smov %s4243_s29 }
 0x22e   : > { %s4598_s29 = smov %s4358_s18  ;;  %s4599_s30 = smov %s4251_s9 }
 0x22f   : > { %s4600_s9 = smov %s4602_s13  ;;  %25 = sbr.rel (!%p23_p7) target bundleno = 9 (0x9), region = 105 }
 0x234   :  { %2598 = vsyncpa [#allocation4], 1 }
 0x235   :  { %2600 = vsyncpa [#allocation4 + $0x1], 1 }
 0x236   :  { %2601 = vsyncpa [#allocation5], 1 }
 0x237   :  { %2603 = vsyncpa [#allocation5 + $0x1], 1 }
 0x238   :  { %2604 = vsyncpa [#allocation8], 1 }
 0x239   :  { %2606 = vsyncpa [#allocation8 + $0x1], 1 }

</bundles_post_ra>
